<compile_context>
chip_gen: v5e
topology: v5e:2x2
jax: 0.10.0
libtpu: 0.0.40
codegen_flags: <defaults>
</compile_context>

<pallas_src>
import jax
import jax.numpy as jnp
import numpy as np
from jax.experimental import pallas as pl
from jax.experimental.pallas import tpu as pltpu


def lstm_tagger_kernel(x_ref, wih_ref, whh_ref, b_ref, wout_ref, bout_ref,
                       out_ref, xg_ref, hs_ref):
    """LSTM recurrence + hidden2tag + log_softmax, lane-padded shapes.

    x_ref    : (T, E)        embedded sentence
    wih_ref  : (E, 4*Hp)     input->gates weights (gate-padded, transposed)
    whh_ref  : (Hp, 4*Hp)    hidden->gates weights (gate-padded, transposed)
    b_ref    : (1, 4*Hp)     combined bias (bias_ih + bias_hh), gate-padded
    wout_ref : (Hp, Tp)      hidden2tag weight (zero-padded, transposed)
    bout_ref : (1, Tp)       hidden2tag bias (-1e30 in padded tag columns)
    out_ref  : (T, Tp)       log_softmax(tag_space), padded tag axis
    xg_ref   : (T, 4*Hp)     VMEM scratch: precomputed X @ W_ih + bias
    hs_ref   : (T, Hp)       VMEM scratch: per-step hidden states
    """
    T = x_ref.shape[0]
    Hp = whh_ref.shape[0]

    # --- hoisted input projection + bias for the whole sequence (one matmul) ---
    xg_ref[...] = (
        jnp.dot(x_ref[...], wih_ref[...], preferred_element_type=jnp.float32)
        + b_ref[...]
    )

    # --- serial recurrence: only h @ W_hh + gate nonlinearity on the hot path ---
    def step(t, carry):
        h, c = carry                                                # (1,Hp),(1,Hp)
        gates = xg_ref[pl.ds(t, 1), :] + jnp.dot(
            h, whh_ref[...], preferred_element_type=jnp.float32)    # (1,4Hp)
        # PyTorch LSTM gate ordering: input, forget, cell(g), output.
        i_g = jax.nn.sigmoid(gates[:, 0 * Hp:1 * Hp])
        f_g = jax.nn.sigmoid(gates[:, 1 * Hp:2 * Hp])
        g_g = jnp.tanh(gates[:, 2 * Hp:3 * Hp])
        o_g = jax.nn.sigmoid(gates[:, 3 * Hp:4 * Hp])
        c_new = f_g * c + i_g * g_g
        h_new = o_g * jnp.tanh(c_new)
        hs_ref[pl.ds(t, 1), :] = h_new
        return (h_new, c_new)

    h0 = jnp.zeros((1, Hp), jnp.float32)
    c0 = jnp.zeros((1, Hp), jnp.float32)
    jax.lax.fori_loop(0, T, step, (h0, c0), unroll=True)

    # --- batched hidden2tag + log_softmax after the loop (one lane-dense store) ---
    tag = (
        jnp.dot(hs_ref[...], wout_ref[...], preferred_element_type=jnp.float32)
        + bout_ref[...]
    )                                                               # (T, Tp)
    m = jnp.max(tag, axis=-1, keepdims=True)
    shifted = tag - m
    lse = jnp.log(jnp.sum(jnp.exp(shifted), axis=-1, keepdims=True))
    out_ref[...] = shifted - lse


def _pad_gate_cols(w_t, H, Hp):
    """Pad each of the 4 gate column-blocks of a (rows, 4H) matrix to Hp."""
    rows = w_t.shape[0]
    w4 = w_t.reshape(rows, 4, H)
    w4 = jnp.pad(w4, ((0, 0), (0, 0), (0, Hp - H)))
    return w4.reshape(rows, 4 * Hp)


def lstm_tagger_forward(sentence_idx, params):
    """Glue: embedding gather + lane padding; recurrence runs in Pallas."""
    emb_table = params["word_embeddings"]                           # (V, E)
    embeds = jnp.take(emb_table, sentence_idx, axis=0).astype(jnp.float32)  # (T, E)

    T, E = embeds.shape
    H = params["hidden_dim"]
    tags = params["tagset_size"]

    LANE = 128
    Hp = ((H + LANE - 1) // LANE) * LANE
    Tp = ((tags + LANE - 1) // LANE) * LANE

    wih_t = params["weight_ih"].T.astype(jnp.float32)               # (E, 4H)
    whh_t = params["weight_hh"].T.astype(jnp.float32)               # (H, 4H)
    bias = (params["bias_ih"] + params["bias_hh"]).astype(jnp.float32)  # (4H,)

    # Gate-aware zero padding: padded hidden lanes stay exactly 0 through the
    # recurrence (sigmoid(0)*0 carries), so numerics are unchanged.
    wih_p = _pad_gate_cols(wih_t, H, Hp)                            # (E, 4Hp)
    whh_p = _pad_gate_cols(jnp.pad(whh_t, ((0, Hp - H), (0, 0))), H, Hp)  # (Hp, 4Hp)
    bias_p = jnp.pad(bias.reshape(4, H), ((0, 0), (0, Hp - H))).reshape(1, 4 * Hp)

    # Tag-axis padding: zero weights + very negative bias -> padded columns
    # contribute exp(-inf)=0 to the softmax normalizer.
    wout_p = jnp.pad(params["hidden2tag_w"].T.astype(jnp.float32),
                     ((0, Hp - H), (0, Tp - tags)))                 # (Hp, Tp)
    bout_p = jnp.concatenate(
        [params["hidden2tag_b"].astype(jnp.float32),
         jnp.full((Tp - tags,), -1e30, jnp.float32)]).reshape(1, Tp)

    vmem = pl.BlockSpec(memory_space=pltpu.MemorySpace.VMEM)
    out_padded = pl.pallas_call(
        lstm_tagger_kernel,
        out_shape=jax.ShapeDtypeStruct((T, Tp), jnp.float32),
        in_specs=[vmem] * 6,
        out_specs=vmem,
        scratch_shapes=[
            pltpu.VMEM((T, 4 * Hp), jnp.float32),   # precomputed input gates
            pltpu.VMEM((T, Hp), jnp.float32),       # hidden-state history
        ],
    )(embeds, wih_p, whh_p, bias_p, wout_p, bout_p)

    return out_padded[:, :tags]


def reference_forward(sentence_idx, params):
    """Pure-JAX reference replicating torch.nn.LSTM / Linear / log_softmax."""
    emb = jnp.take(params["word_embeddings"], sentence_idx, axis=0)
    H = params["hidden_dim"]
    wih, whh = params["weight_ih"], params["weight_hh"]
    b = params["bias_ih"] + params["bias_hh"]
    h = jnp.zeros((H,), jnp.float32)
    c = jnp.zeros((H,), jnp.float32)
    outs = []
    for t in range(emb.shape[0]):
        gates = wih @ emb[t] + whh @ h + b
        i = jax.nn.sigmoid(gates[0 * H:1 * H])
        f = jax.nn.sigmoid(gates[1 * H:2 * H])
        g = jnp.tanh(gates[2 * H:3 * H])
        o = jax.nn.sigmoid(gates[3 * H:4 * H])
        c = f * c + i * g
        h = o * jnp.tanh(c)
        outs.append(h)
    lstm_out = jnp.stack(outs)                                   # (T, H)
    tag_space = lstm_out @ params["hidden2tag_w"].T + params["hidden2tag_b"]
    return jax.nn.log_softmax(tag_space, axis=1)


def make_params(key, unique_items_size, embedding_dim, hidden_dim, tagset_size):
    ks = jax.random.split(key, 7)
    bound = 1.0 / np.sqrt(hidden_dim)
    return {
        "hidden_dim": hidden_dim,
        "tagset_size": tagset_size,
        # nn.Embedding default init: N(0, 1)
        "word_embeddings": jax.random.normal(
            ks[0], (unique_items_size, embedding_dim), jnp.float32),
        # nn.LSTM default init: U(-1/sqrt(H), 1/sqrt(H))
        "weight_ih": jax.random.uniform(
            ks[1], (4 * hidden_dim, embedding_dim), jnp.float32, -bound, bound),
        "weight_hh": jax.random.uniform(
            ks[2], (4 * hidden_dim, hidden_dim), jnp.float32, -bound, bound),
        "bias_ih": jax.random.uniform(
            ks[3], (4 * hidden_dim,), jnp.float32, -bound, bound),
        "bias_hh": jax.random.uniform(
            ks[4], (4 * hidden_dim,), jnp.float32, -bound, bound),
        # nn.Linear default init ~ U(-1/sqrt(H), 1/sqrt(H))
        "hidden2tag_w": jax.random.uniform(
            ks[5], (tagset_size, hidden_dim), jnp.float32, -bound, bound),
        "hidden2tag_b": jax.random.uniform(
            ks[6], (tagset_size,), jnp.float32, -bound, bound),
    }


if __name__ == "__main__":
    key = jax.random.PRNGKey(0)
    seq_len = 8
    embedding_dim = 16
    hidden_dim = 32
    unique_items_size = 20
    tagset_size = 5

    pkey, skey = jax.random.split(key)
    params = make_params(pkey, unique_items_size, embedding_dim, hidden_dim,
                         tagset_size)

    # "sentence" = sequence of item indices (long tensor in PyTorch)
    sentence = jax.random.randint(skey, (seq_len,), 0, unique_items_size, jnp.int32)

    tag_scores = lstm_tagger_forward(sentence, params)
    tag_scores = jax.block_until_ready(tag_scores)

    ref = reference_forward(sentence, params)
    assert tag_scores.shape == (seq_len, tagset_size)
    np.testing.assert_allclose(np.asarray(tag_scores), np.asarray(ref),
                               atol=1e-5, rtol=1e-5)

    print("KERNEL_OK")
</pallas_src>

<mosaic_0001>
module attributes {stable_mosaic.version = 11 : i64} {
  func.func @lstm_tagger_kernel(%arg0: memref<8x16xf32, #tpu.memory_space<vmem>>, %arg1: memref<16x512xf32, #tpu.memory_space<vmem>>, %arg2: memref<128x512xf32, #tpu.memory_space<vmem>>, %arg3: memref<1x512xf32, #tpu.memory_space<vmem>>, %arg4: memref<128x128xf32, #tpu.memory_space<vmem>>, %arg5: memref<1x128xf32, #tpu.memory_space<vmem>>, %arg6: memref<8x128xf32, #tpu.memory_space<vmem>>, %arg7: memref<8x512xf32, #tpu.memory_space<vmem>>, %arg8: memref<8x128xf32, #tpu.memory_space<vmem>>) attributes {dimension_semantics = [], scalar_prefetch = 0 : i64, scratch_operands = 2 : i64, tpu.core_type = #tpu.core_type<tc>} {
    %c0 = arith.constant 0 : index
    %c0_0 = arith.constant 0 : index
    %0 = vector.load %arg0[%c0, %c0_0] : memref<8x16xf32, #tpu.memory_space<vmem>>, vector<8x16xf32>
    %c0_1 = arith.constant 0 : index
    %c0_2 = arith.constant 0 : index
    %1 = vector.load %arg1[%c0_1, %c0_2] : memref<16x512xf32, #tpu.memory_space<vmem>>, vector<16x512xf32>
    %cst = arith.constant dense<0.000000e+00> : vector<8x512xf32>
    %2 = tpu.matmul %0, %1, %cst {dimension_numbers = #tpu.dot_dimension_numbers<[1], [0], [0], [1], [0, 0, 1, 1], [], []>} : vector<8x16xf32>, vector<16x512xf32>, vector<8x512xf32> -> vector<8x512xf32>
    %c0_3 = arith.constant 0 : index
    %c0_4 = arith.constant 0 : index
    %3 = vector.load %arg3[%c0_3, %c0_4] : memref<1x512xf32, #tpu.memory_space<vmem>>, vector<1x512xf32>
    %4 = vector.broadcast %3 : vector<1x512xf32> to vector<8x512xf32>
    %5 = arith.addf %2, %4 : vector<8x512xf32>
    %c0_5 = arith.constant 0 : index
    %c0_6 = arith.constant 0 : index
    %6 = vector.load %arg7[%c0_5, %c0_6] : memref<8x512xf32, #tpu.memory_space<vmem>>, vector<8x512xf32>
    tpu.vector_store %arg7[%c0_5, %c0_6], %5 {strides = array<i32>} : memref<8x512xf32, #tpu.memory_space<vmem>>, vector<8x512xf32>,
    %cst_7 = arith.constant 0.000000e+00 : f32
    %7 = vector.broadcast %cst_7 : f32 to vector<1x128xf32>
    %cst_8 = arith.constant 0.000000e+00 : f32
    %8 = vector.broadcast %cst_8 : f32 to vector<1x128xf32>
    %c0_i32 = arith.constant 0 : i32
    %9 = arith.index_cast %c0_i32 : i32 to index
    %c0_9 = arith.constant 0 : index
    %10 = vector.load %arg7[%9, %c0_9] : memref<8x512xf32, #tpu.memory_space<vmem>>, vector<1x512xf32>
    %c0_10 = arith.constant 0 : index
    %c0_11 = arith.constant 0 : index
    %11 = vector.load %arg2[%c0_10, %c0_11] : memref<128x512xf32, #tpu.memory_space<vmem>>, vector<128x512xf32>
    %cst_12 = arith.constant dense<0.000000e+00> : vector<1x512xf32>
    %12 = tpu.matmul %7, %11, %cst_12 {dimension_numbers = #tpu.dot_dimension_numbers<[1], [0], [0], [1], [0, 0, 1, 1], [], []>} : vector<1x128xf32>, vector<128x512xf32>, vector<1x512xf32> -> vector<1x512xf32>
    %13 = arith.addf %10, %12 : vector<1x512xf32>
    %14 = vector.extract_strided_slice %13 {offsets = [0, 0], sizes = [1, 128], strides = [1, 1]} : vector<1x512xf32> to vector<1x128xf32>
    %15 = arith.negf %14 : vector<1x128xf32>
    %16 = math.exp %15 : vector<1x128xf32>
    %cst_13 = arith.constant 1.000000e+00 : f32
    %17 = vector.broadcast %cst_13 : f32 to vector<1x128xf32>
    %18 = arith.addf %17, %16 : vector<1x128xf32>
    %19 = arith.divf %17, %18 : vector<1x128xf32>
    %20 = vector.extract_strided_slice %13 {offsets = [0, 128], sizes = [1, 128], strides = [1, 1]} : vector<1x512xf32> to vector<1x128xf32>
    %21 = arith.negf %20 : vector<1x128xf32>
    %22 = math.exp %21 : vector<1x128xf32>
    %cst_14 = arith.constant 1.000000e+00 : f32
    %23 = vector.broadcast %cst_14 : f32 to vector<1x128xf32>
    %24 = arith.addf %23, %22 : vector<1x128xf32>
    %25 = arith.divf %23, %24 : vector<1x128xf32>
    %26 = vector.extract_strided_slice %13 {offsets = [0, 256], sizes = [1, 128], strides = [1, 1]} : vector<1x512xf32> to vector<1x128xf32>
    %27 = math.tanh %26 : vector<1x128xf32>
    %28 = vector.extract_strided_slice %13 {offsets = [0, 384], sizes = [1, 128], strides = [1, 1]} : vector<1x512xf32> to vector<1x128xf32>
    %29 = arith.negf %28 : vector<1x128xf32>
    %30 = math.exp %29 : vector<1x128xf32>
    %cst_15 = arith.constant 1.000000e+00 : f32
    %31 = vector.broadcast %cst_15 : f32 to vector<1x128xf32>
    %32 = arith.addf %31, %30 : vector<1x128xf32>
    %33 = arith.divf %31, %32 : vector<1x128xf32>
    %34 = arith.mulf %25, %8 : vector<1x128xf32>
    %35 = arith.mulf %19, %27 : vector<1x128xf32>
    %36 = arith.addf %34, %35 : vector<1x128xf32>
    %37 = math.tanh %36 : vector<1x128xf32>
    %38 = arith.mulf %33, %37 : vector<1x128xf32>
    %39 = arith.index_cast %c0_i32 : i32 to index
    %c0_16 = arith.constant 0 : index
    %40 = vector.load %arg8[%39, %c0_16] : memref<8x128xf32, #tpu.memory_space<vmem>>, vector<1x128xf32>
    tpu.vector_store %arg8[%39, %c0_16], %38 {strides = array<i32>} : memref<8x128xf32, #tpu.memory_space<vmem>>, vector<1x128xf32>,
    %c1_i32 = arith.constant 1 : i32
    %41 = arith.index_cast %c1_i32 : i32 to index
    %c0_17 = arith.constant 0 : index
    %42 = vector.load %arg7[%41, %c0_17] : memref<8x512xf32, #tpu.memory_space<vmem>>, vector<1x512xf32>
    %c0_18 = arith.constant 0 : index
    %c0_19 = arith.constant 0 : index
    %43 = vector.load %arg2[%c0_18, %c0_19] : memref<128x512xf32, #tpu.memory_space<vmem>>, vector<128x512xf32>
    %cst_20 = arith.constant dense<0.000000e+00> : vector<1x512xf32>
    %44 = tpu.matmul %38, %43, %cst_20 {dimension_numbers = #tpu.dot_dimension_numbers<[1], [0], [0], [1], [0, 0, 1, 1], [], []>} : vector<1x128xf32>, vector<128x512xf32>, vector<1x512xf32> -> vector<1x512xf32>
    %45 = arith.addf %42, %44 : vector<1x512xf32>
    %46 = vector.extract_strided_slice %45 {offsets = [0, 0], sizes = [1, 128], strides = [1, 1]} : vector<1x512xf32> to vector<1x128xf32>
    %47 = arith.negf %46 : vector<1x128xf32>
    %48 = math.exp %47 : vector<1x128xf32>
    %cst_21 = arith.constant 1.000000e+00 : f32
    %49 = vector.broadcast %cst_21 : f32 to vector<1x128xf32>
    %50 = arith.addf %49, %48 : vector<1x128xf32>
    %51 = arith.divf %49, %50 : vector<1x128xf32>
    %52 = vector.extract_strided_slice %45 {offsets = [0, 128], sizes = [1, 128], strides = [1, 1]} : vector<1x512xf32> to vector<1x128xf32>
    %53 = arith.negf %52 : vector<1x128xf32>
    %54 = math.exp %53 : vector<1x128xf32>
    %cst_22 = arith.constant 1.000000e+00 : f32
    %55 = vector.broadcast %cst_22 : f32 to vector<1x128xf32>
    %56 = arith.addf %55, %54 : vector<1x128xf32>
    %57 = arith.divf %55, %56 : vector<1x128xf32>
    %58 = vector.extract_strided_slice %45 {offsets = [0, 256], sizes = [1, 128], strides = [1, 1]} : vector<1x512xf32> to vector<1x128xf32>
    %59 = math.tanh %58 : vector<1x128xf32>
    %60 = vector.extract_strided_slice %45 {offsets = [0, 384], sizes = [1, 128], strides = [1, 1]} : vector<1x512xf32> to vector<1x128xf32>
    %61 = arith.negf %60 : vector<1x128xf32>
    %62 = math.exp %61 : vector<1x128xf32>
    %cst_23 = arith.constant 1.000000e+00 : f32
    %63 = vector.broadcast %cst_23 : f32 to vector<1x128xf32>
    %64 = arith.addf %63, %62 : vector<1x128xf32>
    %65 = arith.divf %63, %64 : vector<1x128xf32>
    %66 = arith.mulf %57, %36 : vector<1x128xf32>
    %67 = arith.mulf %51, %59 : vector<1x128xf32>
    %68 = arith.addf %66, %67 : vector<1x128xf32>
    %69 = math.tanh %68 : vector<1x128xf32>
    %70 = arith.mulf %65, %69 : vector<1x128xf32>
    %71 = arith.index_cast %c1_i32 : i32 to index
    %c0_24 = arith.constant 0 : index
    %72 = vector.load %arg8[%71, %c0_24] : memref<8x128xf32, #tpu.memory_space<vmem>>, vector<1x128xf32>
    tpu.vector_store %arg8[%71, %c0_24], %70 {strides = array<i32>} : memref<8x128xf32, #tpu.memory_space<vmem>>, vector<1x128xf32>,
    %c2_i32 = arith.constant 2 : i32
    %73 = arith.index_cast %c2_i32 : i32 to index
    %c0_25 = arith.constant 0 : index
    %74 = vector.load %arg7[%73, %c0_25] : memref<8x512xf32, #tpu.memory_space<vmem>>, vector<1x512xf32>
    %c0_26 = arith.constant 0 : index
    %c0_27 = arith.constant 0 : index
    %75 = vector.load %arg2[%c0_26, %c0_27] : memref<128x512xf32, #tpu.memory_space<vmem>>, vector<128x512xf32>
    %cst_28 = arith.constant dense<0.000000e+00> : vector<1x512xf32>
    %76 = tpu.matmul %70, %75, %cst_28 {dimension_numbers = #tpu.dot_dimension_numbers<[1], [0], [0], [1], [0, 0, 1, 1], [], []>} : vector<1x128xf32>, vector<128x512xf32>, vector<1x512xf32> -> vector<1x512xf32>
    %77 = arith.addf %74, %76 : vector<1x512xf32>
    %78 = vector.extract_strided_slice %77 {offsets = [0, 0], sizes = [1, 128], strides = [1, 1]} : vector<1x512xf32> to vector<1x128xf32>
    %79 = arith.negf %78 : vector<1x128xf32>
    %80 = math.exp %79 : vector<1x128xf32>
    %cst_29 = arith.constant 1.000000e+00 : f32
    %81 = vector.broadcast %cst_29 : f32 to vector<1x128xf32>
    %82 = arith.addf %81, %80 : vector<1x128xf32>
    %83 = arith.divf %81, %82 : vector<1x128xf32>
    %84 = vector.extract_strided_slice %77 {offsets = [0, 128], sizes = [1, 128], strides = [1, 1]} : vector<1x512xf32> to vector<1x128xf32>
    %85 = arith.negf %84 : vector<1x128xf32>
    %86 = math.exp %85 : vector<1x128xf32>
    %cst_30 = arith.constant 1.000000e+00 : f32
    %87 = vector.broadcast %cst_30 : f32 to vector<1x128xf32>
    %88 = arith.addf %87, %86 : vector<1x128xf32>
    %89 = arith.divf %87, %88 : vector<1x128xf32>
    %90 = vector.extract_strided_slice %77 {offsets = [0, 256], sizes = [1, 128], strides = [1, 1]} : vector<1x512xf32> to vector<1x128xf32>
    %91 = math.tanh %90 : vector<1x128xf32>
    %92 = vector.extract_strided_slice %77 {offsets = [0, 384], sizes = [1, 128], strides = [1, 1]} : vector<1x512xf32> to vector<1x128xf32>
    %93 = arith.negf %92 : vector<1x128xf32>
    %94 = math.exp %93 : vector<1x128xf32>
    %cst_31 = arith.constant 1.000000e+00 : f32
    %95 = vector.broadcast %cst_31 : f32 to vector<1x128xf32>
    %96 = arith.addf %95, %94 : vector<1x128xf32>
    %97 = arith.divf %95, %96 : vector<1x128xf32>
    %98 = arith.mulf %89, %68 : vector<1x128xf32>
    %99 = arith.mulf %83, %91 : vector<1x128xf32>
    %100 = arith.addf %98, %99 : vector<1x128xf32>
    %101 = math.tanh %100 : vector<1x128xf32>
    %102 = arith.mulf %97, %101 : vector<1x128xf32>
    %103 = arith.index_cast %c2_i32 : i32 to index
    %c0_32 = arith.constant 0 : index
    %104 = vector.load %arg8[%103, %c0_32] : memref<8x128xf32, #tpu.memory_space<vmem>>, vector<1x128xf32>
    tpu.vector_store %arg8[%103, %c0_32], %102 {strides = array<i32>} : memref<8x128xf32, #tpu.memory_space<vmem>>, vector<1x128xf32>,
    %c3_i32 = arith.constant 3 : i32
    %105 = arith.index_cast %c3_i32 : i32 to index
    %c0_33 = arith.constant 0 : index
    %106 = vector.load %arg7[%105, %c0_33] : memref<8x512xf32, #tpu.memory_space<vmem>>, vector<1x512xf32>
    %c0_34 = arith.constant 0 : index
    %c0_35 = arith.constant 0 : index
    %107 = vector.load %arg2[%c0_34, %c0_35] : memref<128x512xf32, #tpu.memory_space<vmem>>, vector<128x512xf32>
    %cst_36 = arith.constant dense<0.000000e+00> : vector<1x512xf32>
    %108 = tpu.matmul %102, %107, %cst_36 {dimension_numbers = #tpu.dot_dimension_numbers<[1], [0], [0], [1], [0, 0, 1, 1], [], []>} : vector<1x128xf32>, vector<128x512xf32>, vector<1x512xf32> -> vector<1x512xf32>
    %109 = arith.addf %106, %108 : vector<1x512xf32>
    %110 = vector.extract_strided_slice %109 {offsets = [0, 0], sizes = [1, 128], strides = [1, 1]} : vector<1x512xf32> to vector<1x128xf32>
    %111 = arith.negf %110 : vector<1x128xf32>
    %112 = math.exp %111 : vector<1x128xf32>
    %cst_37 = arith.constant 1.000000e+00 : f32
    %113 = vector.broadcast %cst_37 : f32 to vector<1x128xf32>
    %114 = arith.addf %113, %112 : vector<1x128xf32>
    %115 = arith.divf %113, %114 : vector<1x128xf32>
    %116 = vector.extract_strided_slice %109 {offsets = [0, 128], sizes = [1, 128], strides = [1, 1]} : vector<1x512xf32> to vector<1x128xf32>
    %117 = arith.negf %116 : vector<1x128xf32>
    %118 = math.exp %117 : vector<1x128xf32>
    %cst_38 = arith.constant 1.000000e+00 : f32
    %119 = vector.broadcast %cst_38 : f32 to vector<1x128xf32>
    %120 = arith.addf %119, %118 : vector<1x128xf32>
    %121 = arith.divf %119, %120 : vector<1x128xf32>
    %122 = vector.extract_strided_slice %109 {offsets = [0, 256], sizes = [1, 128], strides = [1, 1]} : vector<1x512xf32> to vector<1x128xf32>
    %123 = math.tanh %122 : vector<1x128xf32>
    %124 = vector.extract_strided_slice %109 {offsets = [0, 384], sizes = [1, 128], strides = [1, 1]} : vector<1x512xf32> to vector<1x128xf32>
    %125 = arith.negf %124 : vector<1x128xf32>
    %126 = math.exp %125 : vector<1x128xf32>
    %cst_39 = arith.constant 1.000000e+00 : f32
    %127 = vector.broadcast %cst_39 : f32 to vector<1x128xf32>
    %128 = arith.addf %127, %126 : vector<1x128xf32>
    %129 = arith.divf %127, %128 : vector<1x128xf32>
    %130 = arith.mulf %121, %100 : vector<1x128xf32>
    %131 = arith.mulf %115, %123 : vector<1x128xf32>
    %132 = arith.addf %130, %131 : vector<1x128xf32>
    %133 = math.tanh %132 : vector<1x128xf32>
    %134 = arith.mulf %129, %133 : vector<1x128xf32>
    %135 = arith.index_cast %c3_i32 : i32 to index
    %c0_40 = arith.constant 0 : index
    %136 = vector.load %arg8[%135, %c0_40] : memref<8x128xf32, #tpu.memory_space<vmem>>, vector<1x128xf32>
    tpu.vector_store %arg8[%135, %c0_40], %134 {strides = array<i32>} : memref<8x128xf32, #tpu.memory_space<vmem>>, vector<1x128xf32>,
    %c4_i32 = arith.constant 4 : i32
    %137 = arith.index_cast %c4_i32 : i32 to index
    %c0_41 = arith.constant 0 : index
    %138 = vector.load %arg7[%137, %c0_41] : memref<8x512xf32, #tpu.memory_space<vmem>>, vector<1x512xf32>
    %c0_42 = arith.constant 0 : index
    %c0_43 = arith.constant 0 : index
    %139 = vector.load %arg2[%c0_42, %c0_43] : memref<128x512xf32, #tpu.memory_space<vmem>>, vector<128x512xf32>
    %cst_44 = arith.constant dense<0.000000e+00> : vector<1x512xf32>
    %140 = tpu.matmul %134, %139, %cst_44 {dimension_numbers = #tpu.dot_dimension_numbers<[1], [0], [0], [1], [0, 0, 1, 1], [], []>} : vector<1x128xf32>, vector<128x512xf32>, vector<1x512xf32> -> vector<1x512xf32>
    %141 = arith.addf %138, %140 : vector<1x512xf32>
    %142 = vector.extract_strided_slice %141 {offsets = [0, 0], sizes = [1, 128], strides = [1, 1]} : vector<1x512xf32> to vector<1x128xf32>
    %143 = arith.negf %142 : vector<1x128xf32>
    %144 = math.exp %143 : vector<1x128xf32>
    %cst_45 = arith.constant 1.000000e+00 : f32
    %145 = vector.broadcast %cst_45 : f32 to vector<1x128xf32>
    %146 = arith.addf %145, %144 : vector<1x128xf32>
    %147 = arith.divf %145, %146 : vector<1x128xf32>
    %148 = vector.extract_strided_slice %141 {offsets = [0, 128], sizes = [1, 128], strides = [1, 1]} : vector<1x512xf32> to vector<1x128xf32>
    %149 = arith.negf %148 : vector<1x128xf32>
    %150 = math.exp %149 : vector<1x128xf32>
    %cst_46 = arith.constant 1.000000e+00 : f32
    %151 = vector.broadcast %cst_46 : f32 to vector<1x128xf32>
    %152 = arith.addf %151, %150 : vector<1x128xf32>
    %153 = arith.divf %151, %152 : vector<1x128xf32>
    %154 = vector.extract_strided_slice %141 {offsets = [0, 256], sizes = [1, 128], strides = [1, 1]} : vector<1x512xf32> to vector<1x128xf32>
    %155 = math.tanh %154 : vector<1x128xf32>
    %156 = vector.extract_strided_slice %141 {offsets = [0, 384], sizes = [1, 128], strides = [1, 1]} : vector<1x512xf32> to vector<1x128xf32>
    %157 = arith.negf %156 : vector<1x128xf32>
    %158 = math.exp %157 : vector<1x128xf32>
    %cst_47 = arith.constant 1.000000e+00 : f32
    %159 = vector.broadcast %cst_47 : f32 to vector<1x128xf32>
    %160 = arith.addf %159, %158 : vector<1x128xf32>
    %161 = arith.divf %159, %160 : vector<1x128xf32>
    %162 = arith.mulf %153, %132 : vector<1x128xf32>
    %163 = arith.mulf %147, %155 : vector<1x128xf32>
    %164 = arith.addf %162, %163 : vector<1x128xf32>
    %165 = math.tanh %164 : vector<1x128xf32>
    %166 = arith.mulf %161, %165 : vector<1x128xf32>
    %167 = arith.index_cast %c4_i32 : i32 to index
    %c0_48 = arith.constant 0 : index
    %168 = vector.load %arg8[%167, %c0_48] : memref<8x128xf32, #tpu.memory_space<vmem>>, vector<1x128xf32>
    tpu.vector_store %arg8[%167, %c0_48], %166 {strides = array<i32>} : memref<8x128xf32, #tpu.memory_space<vmem>>, vector<1x128xf32>,
    %c5_i32 = arith.constant 5 : i32
    %169 = arith.index_cast %c5_i32 : i32 to index
    %c0_49 = arith.constant 0 : index
    %170 = vector.load %arg7[%169, %c0_49] : memref<8x512xf32, #tpu.memory_space<vmem>>, vector<1x512xf32>
    %c0_50 = arith.constant 0 : index
    %c0_51 = arith.constant 0 : index
    %171 = vector.load %arg2[%c0_50, %c0_51] : memref<128x512xf32, #tpu.memory_space<vmem>>, vector<128x512xf32>
    %cst_52 = arith.constant dense<0.000000e+00> : vector<1x512xf32>
    %172 = tpu.matmul %166, %171, %cst_52 {dimension_numbers = #tpu.dot_dimension_numbers<[1], [0], [0], [1], [0, 0, 1, 1], [], []>} : vector<1x128xf32>, vector<128x512xf32>, vector<1x512xf32> -> vector<1x512xf32>
    %173 = arith.addf %170, %172 : vector<1x512xf32>
    %174 = vector.extract_strided_slice %173 {offsets = [0, 0], sizes = [1, 128], strides = [1, 1]} : vector<1x512xf32> to vector<1x128xf32>
    %175 = arith.negf %174 : vector<1x128xf32>
    %176 = math.exp %175 : vector<1x128xf32>
    %cst_53 = arith.constant 1.000000e+00 : f32
    %177 = vector.broadcast %cst_53 : f32 to vector<1x128xf32>
    %178 = arith.addf %177, %176 : vector<1x128xf32>
    %179 = arith.divf %177, %178 : vector<1x128xf32>
    %180 = vector.extract_strided_slice %173 {offsets = [0, 128], sizes = [1, 128], strides = [1, 1]} : vector<1x512xf32> to vector<1x128xf32>
    %181 = arith.negf %180 : vector<1x128xf32>
    %182 = math.exp %181 : vector<1x128xf32>
    %cst_54 = arith.constant 1.000000e+00 : f32
    %183 = vector.broadcast %cst_54 : f32 to vector<1x128xf32>
    %184 = arith.addf %183, %182 : vector<1x128xf32>
    %185 = arith.divf %183, %184 : vector<1x128xf32>
    %186 = vector.extract_strided_slice %173 {offsets = [0, 256], sizes = [1, 128], strides = [1, 1]} : vector<1x512xf32> to vector<1x128xf32>
    %187 = math.tanh %186 : vector<1x128xf32>
    %188 = vector.extract_strided_slice %173 {offsets = [0, 384], sizes = [1, 128], strides = [1, 1]} : vector<1x512xf32> to vector<1x128xf32>
    %189 = arith.negf %188 : vector<1x128xf32>
    %190 = math.exp %189 : vector<1x128xf32>
    %cst_55 = arith.constant 1.000000e+00 : f32
    %191 = vector.broadcast %cst_55 : f32 to vector<1x128xf32>
    %192 = arith.addf %191, %190 : vector<1x128xf32>
    %193 = arith.divf %191, %192 : vector<1x128xf32>
    %194 = arith.mulf %185, %164 : vector<1x128xf32>
    %195 = arith.mulf %179, %187 : vector<1x128xf32>
    %196 = arith.addf %194, %195 : vector<1x128xf32>
    %197 = math.tanh %196 : vector<1x128xf32>
    %198 = arith.mulf %193, %197 : vector<1x128xf32>
    %199 = arith.index_cast %c5_i32 : i32 to index
    %c0_56 = arith.constant 0 : index
    %200 = vector.load %arg8[%199, %c0_56] : memref<8x128xf32, #tpu.memory_space<vmem>>, vector<1x128xf32>
    tpu.vector_store %arg8[%199, %c0_56], %198 {strides = array<i32>} : memref<8x128xf32, #tpu.memory_space<vmem>>, vector<1x128xf32>,
    %c6_i32 = arith.constant 6 : i32
    %201 = arith.index_cast %c6_i32 : i32 to index
    %c0_57 = arith.constant 0 : index
    %202 = vector.load %arg7[%201, %c0_57] : memref<8x512xf32, #tpu.memory_space<vmem>>, vector<1x512xf32>
    %c0_58 = arith.constant 0 : index
    %c0_59 = arith.constant 0 : index
    %203 = vector.load %arg2[%c0_58, %c0_59] : memref<128x512xf32, #tpu.memory_space<vmem>>, vector<128x512xf32>
    %cst_60 = arith.constant dense<0.000000e+00> : vector<1x512xf32>
    %204 = tpu.matmul %198, %203, %cst_60 {dimension_numbers = #tpu.dot_dimension_numbers<[1], [0], [0], [1], [0, 0, 1, 1], [], []>} : vector<1x128xf32>, vector<128x512xf32>, vector<1x512xf32> -> vector<1x512xf32>
    %205 = arith.addf %202, %204 : vector<1x512xf32>
    %206 = vector.extract_strided_slice %205 {offsets = [0, 0], sizes = [1, 128], strides = [1, 1]} : vector<1x512xf32> to vector<1x128xf32>
    %207 = arith.negf %206 : vector<1x128xf32>
    %208 = math.exp %207 : vector<1x128xf32>
    %cst_61 = arith.constant 1.000000e+00 : f32
    %209 = vector.broadcast %cst_61 : f32 to vector<1x128xf32>
    %210 = arith.addf %209, %208 : vector<1x128xf32>
    %211 = arith.divf %209, %210 : vector<1x128xf32>
    %212 = vector.extract_strided_slice %205 {offsets = [0, 128], sizes = [1, 128], strides = [1, 1]} : vector<1x512xf32> to vector<1x128xf32>
    %213 = arith.negf %212 : vector<1x128xf32>
    %214 = math.exp %213 : vector<1x128xf32>
    %cst_62 = arith.constant 1.000000e+00 : f32
    %215 = vector.broadcast %cst_62 : f32 to vector<1x128xf32>
    %216 = arith.addf %215, %214 : vector<1x128xf32>
    %217 = arith.divf %215, %216 : vector<1x128xf32>
    %218 = vector.extract_strided_slice %205 {offsets = [0, 256], sizes = [1, 128], strides = [1, 1]} : vector<1x512xf32> to vector<1x128xf32>
    %219 = math.tanh %218 : vector<1x128xf32>
    %220 = vector.extract_strided_slice %205 {offsets = [0, 384], sizes = [1, 128], strides = [1, 1]} : vector<1x512xf32> to vector<1x128xf32>
    %221 = arith.negf %220 : vector<1x128xf32>
    %222 = math.exp %221 : vector<1x128xf32>
    %cst_63 = arith.constant 1.000000e+00 : f32
    %223 = vector.broadcast %cst_63 : f32 to vector<1x128xf32>
    %224 = arith.addf %223, %222 : vector<1x128xf32>
    %225 = arith.divf %223, %224 : vector<1x128xf32>
    %226 = arith.mulf %217, %196 : vector<1x128xf32>
    %227 = arith.mulf %211, %219 : vector<1x128xf32>
    %228 = arith.addf %226, %227 : vector<1x128xf32>
    %229 = math.tanh %228 : vector<1x128xf32>
    %230 = arith.mulf %225, %229 : vector<1x128xf32>
    %231 = arith.index_cast %c6_i32 : i32 to index
    %c0_64 = arith.constant 0 : index
    %232 = vector.load %arg8[%231, %c0_64] : memref<8x128xf32, #tpu.memory_space<vmem>>, vector<1x128xf32>
    tpu.vector_store %arg8[%231, %c0_64], %230 {strides = array<i32>} : memref<8x128xf32, #tpu.memory_space<vmem>>, vector<1x128xf32>,
    %c7_i32 = arith.constant 7 : i32
    %233 = arith.index_cast %c7_i32 : i32 to index
    %c0_65 = arith.constant 0 : index
    %234 = vector.load %arg7[%233, %c0_65] : memref<8x512xf32, #tpu.memory_space<vmem>>, vector<1x512xf32>
    %c0_66 = arith.constant 0 : index
    %c0_67 = arith.constant 0 : index
    %235 = vector.load %arg2[%c0_66, %c0_67] : memref<128x512xf32, #tpu.memory_space<vmem>>, vector<128x512xf32>
    %cst_68 = arith.constant dense<0.000000e+00> : vector<1x512xf32>
    %236 = tpu.matmul %230, %235, %cst_68 {dimension_numbers = #tpu.dot_dimension_numbers<[1], [0], [0], [1], [0, 0, 1, 1], [], []>} : vector<1x128xf32>, vector<128x512xf32>, vector<1x512xf32> -> vector<1x512xf32>
    %237 = arith.addf %234, %236 : vector<1x512xf32>
    %238 = vector.extract_strided_slice %237 {offsets = [0, 0], sizes = [1, 128], strides = [1, 1]} : vector<1x512xf32> to vector<1x128xf32>
    %239 = arith.negf %238 : vector<1x128xf32>
    %240 = math.exp %239 : vector<1x128xf32>
    %cst_69 = arith.constant 1.000000e+00 : f32
    %241 = vector.broadcast %cst_69 : f32 to vector<1x128xf32>
    %242 = arith.addf %241, %240 : vector<1x128xf32>
    %243 = arith.divf %241, %242 : vector<1x128xf32>
    %244 = vector.extract_strided_slice %237 {offsets = [0, 128], sizes = [1, 128], strides = [1, 1]} : vector<1x512xf32> to vector<1x128xf32>
    %245 = arith.negf %244 : vector<1x128xf32>
    %246 = math.exp %245 : vector<1x128xf32>
    %cst_70 = arith.constant 1.000000e+00 : f32
    %247 = vector.broadcast %cst_70 : f32 to vector<1x128xf32>
    %248 = arith.addf %247, %246 : vector<1x128xf32>
    %249 = arith.divf %247, %248 : vector<1x128xf32>
    %250 = vector.extract_strided_slice %237 {offsets = [0, 256], sizes = [1, 128], strides = [1, 1]} : vector<1x512xf32> to vector<1x128xf32>
    %251 = math.tanh %250 : vector<1x128xf32>
    %252 = vector.extract_strided_slice %237 {offsets = [0, 384], sizes = [1, 128], strides = [1, 1]} : vector<1x512xf32> to vector<1x128xf32>
    %253 = arith.negf %252 : vector<1x128xf32>
    %254 = math.exp %253 : vector<1x128xf32>
    %cst_71 = arith.constant 1.000000e+00 : f32
    %255 = vector.broadcast %cst_71 : f32 to vector<1x128xf32>
    %256 = arith.addf %255, %254 : vector<1x128xf32>
    %257 = arith.divf %255, %256 : vector<1x128xf32>
    %258 = arith.mulf %249, %228 : vector<1x128xf32>
    %259 = arith.mulf %243, %251 : vector<1x128xf32>
    %260 = arith.addf %258, %259 : vector<1x128xf32>
    %261 = math.tanh %260 : vector<1x128xf32>
    %262 = arith.mulf %257, %261 : vector<1x128xf32>
    %263 = arith.index_cast %c7_i32 : i32 to index
    %c0_72 = arith.constant 0 : index
    %264 = vector.load %arg8[%263, %c0_72] : memref<8x128xf32, #tpu.memory_space<vmem>>, vector<1x128xf32>
    tpu.vector_store %arg8[%263, %c0_72], %262 {strides = array<i32>} : memref<8x128xf32, #tpu.memory_space<vmem>>, vector<1x128xf32>,
    %c8_i32 = arith.constant 8 : i32
    %c0_73 = arith.constant 0 : index
    %c0_74 = arith.constant 0 : index
    %265 = vector.load %arg8[%c0_73, %c0_74] : memref<8x128xf32, #tpu.memory_space<vmem>>, vector<8x128xf32>
    %c0_75 = arith.constant 0 : index
    %c0_76 = arith.constant 0 : index
    %266 = vector.load %arg4[%c0_75, %c0_76] : memref<128x128xf32, #tpu.memory_space<vmem>>, vector<128x128xf32>
    %cst_77 = arith.constant dense<0.000000e+00> : vector<8x128xf32>
    %267 = tpu.matmul %265, %266, %cst_77 {dimension_numbers = #tpu.dot_dimension_numbers<[1], [0], [0], [1], [0, 0, 1, 1], [], []>} : vector<8x128xf32>, vector<128x128xf32>, vector<8x128xf32> -> vector<8x128xf32>
    %c0_78 = arith.constant 0 : index
    %c0_79 = arith.constant 0 : index
    %268 = vector.load %arg5[%c0_78, %c0_79] : memref<1x128xf32, #tpu.memory_space<vmem>>, vector<1x128xf32>
    %269 = vector.broadcast %268 : vector<1x128xf32> to vector<8x128xf32>
    %270 = arith.addf %267, %269 : vector<8x128xf32>
    %cst_80 = arith.constant dense<0xFF800000> : vector<8xf32>
    %271 = vector.multi_reduction <maximumf>, %270, %cst_80 [1] : vector<8x128xf32> to vector<8xf32>
    %272 = vector.shape_cast %271 : vector<8xf32> to vector<8x1xf32>
    %273 = vector.broadcast %272 : vector<8x1xf32> to vector<8x128xf32>
    %274 = arith.subf %270, %273 : vector<8x128xf32>
    %275 = math.exp %274 : vector<8x128xf32>
    %cst_81 = arith.constant dense<0.000000e+00> : vector<8xf32>
    %276 = vector.multi_reduction <add>, %275, %cst_81 [1] : vector<8x128xf32> to vector<8xf32>
    %277 = vector.shape_cast %276 : vector<8xf32> to vector<8x1xf32>
    %278 = math.log %277 : vector<8x1xf32>
    %279 = vector.broadcast %278 : vector<8x1xf32> to vector<8x128xf32>
    %280 = arith.subf %274, %279 : vector<8x128xf32>
    %c0_82 = arith.constant 0 : index
    %c0_83 = arith.constant 0 : index
    %281 = vector.load %arg6[%c0_82, %c0_83] : memref<8x128xf32, #tpu.memory_space<vmem>>, vector<8x128xf32>
    tpu.vector_store %arg6[%c0_82, %c0_83], %280 {strides = array<i32>} : memref<8x128xf32, #tpu.memory_space<vmem>>, vector<8x128xf32>,
    return
  }
}

</mosaic_0001>

<bundles_post_ra>
// kernel: tpu_custom_call.1
= control target key start
LH: loop header
LB: loop body
LE: loop exit
PB: predicated region body
PF: predicated region fallthrough
CT: control target
= control target key end

     0   :  { %11 = vsyncpa [#allocation5], 0  ;;  %s3525_s0 = inlined_call_operand.hbm [shape: f32[8,16], index: 0, kind: input, shape index: {}]   ;;  %s3526_s1 = inlined_call_operand.hbm [shape: f32[16,512], index: 1, kind: input, shape index: {}]   ;;  %s3527_s2 = inlined_call_operand.hbm [shape: f32[128,512], index: 2, kind: input, shape index: {}]   ;;  %s3528_s3 = inlined_call_operand.hbm [shape: f32[1,512], index: 3, kind: input, shape index: {}]   ;;  %s3529_s4 = inlined_call_operand.hbm [shape: f32[128,128], index: 4, kind: input, shape index: {}]   ;;  %s3530_s5 = inlined_call_operand.vmem [shape: f32[1,128], index: 5, kind: input, shape index: {}]   ;;  %s3531_s6 = inlined_call_operand.hbm [shape: f32[8,128], index: 6, kind: output, shape index: {}]  }
   0x1   :  { %12 = vsyncpa [#allocation8], 0 }
   0x2   :  { %13 = vsyncpa [#allocation11], 0  ;;  %s30_s23 = sshll.u32 %s3526_s1, 4  ;;  %s31_s23 = int_to_ptr.hbm [resolvable:$true] %s30_s23 }
   0x3   :  { %14 = vsyncpa [#allocation6], 0  ;;  %s2434_s24 = smov [#allocation7]   ;;  %s57_s28 = sshll.u32 %s3528_s3, 4  ;;  %s58_s28 = int_to_ptr.hbm [resolvable:$true] %s57_s28 }
   0x4   :  { %s32_s25 = sshll.u32 %s2434_s24, 4  ;;  %s2435_s29 = smov 512   ;;  %s33_s25 = int_to_ptr.vmem [resolvable:$true] %s32_s25 }
   0x5   :  { %s2436_s30 = smov 32   ;;  %s2437_s7 = smov [#allocation10]  }
   0x6   :  { %38 = dma.hbm_to_vmem [thread:$0]  %s31_s23, 1024, %s33_s25, [#allocation8], %s2435_s29, %s2435_s29, %s2436_s30  }
   0x7   :  { %s59_s8 = sshll.u32 %s2437_s7, 4  ;;  %s20_s11 = sshll.u32 %s3525_s0, 4  ;;  %s60_s8 = int_to_ptr.vmem [resolvable:$true] %s59_s8  ;;  %s21_s11 = int_to_ptr.hbm [resolvable:$true] %s20_s11 }
   0x8   :  { %62 = dma.hbm_to_vmem [thread:$0]  %s58_s28, 64, %s60_s8, [#allocation11]  }
   0x9   :  { %s43_s13 = sshll.u32 %s3527_s2, 4  ;;  %s2438_s14 = smov [#allocation4]   ;;  %s44_s13 = int_to_ptr.hbm [resolvable:$true] %s43_s13 }
   0xa   :  { %s22_s15 = sshll.u32 %s2438_s14, 4  ;;  %s2439_s3 = smov [#allocation9]   ;;  %s23_s15 = int_to_ptr.vmem [resolvable:$true] %s22_s15 }
   0xb   :  { %25 = dma.hbm_to_vmem [thread:$0]  %s21_s11, 128, %s23_s15, [#allocation5]  }
   0xc   :  { %s45_s16 = sshll.u32 %s2439_s3, 4  ;;  %s67_s19 = sshll.u32 %s3529_s4, 4  ;;  %s46_s16 = int_to_ptr.vmem [resolvable:$true] %s45_s16  ;;  %s68_s19 = int_to_ptr.hbm [resolvable:$true] %s67_s19 }
   0xd   :  { %51 = dma.hbm_to_vmem [thread:$0]  %s44_s13, 8192, %s46_s16, [#allocation8], %s2435_s29, %s2435_s29, %s2436_s30  }
   0xe   :  { %s2440_s0 = smov [#allocation12]   ;;  %s2441_s21 = smov 128  }
   0xf   :  { %s69_s20 = sshll.u32 %s2440_s0, 4  ;;  %s2442_s22 = smov 8   ;;  %s70_s20 = int_to_ptr.vmem [resolvable:$true] %s69_s20 }
  0x10   :  { %75 = dma.hbm_to_vmem [thread:$0]  %s68_s19, 2048, %s70_s20, [#allocation11], %s2441_s21, %s2441_s21, %s2442_s22  }
  0x11   :  { %2426 = dma.done.wait [#allocation5], 128  }
  0x12   :  { %2427 = vsyncadd [#allocation5], 4294967168 }
  0x13   :  { %2428 = dma.done.wait [#allocation8], 9216  }
  0x14   :  { %2429 = vsyncadd [#allocation8], 4294958080 }
  0x15   :  { %2430 = dma.done.wait [#allocation11], 2112  }
  0x16   :  { %2431 = vsyncadd [#allocation11], 4294965184  ;;  %v103_v0 = vld [vmem:[#allocation7 + $0x20] sm:$0xff]  ;;  %v105_v1 = vld [vmem:[#allocation7 + $0x30] sm:$0xff]  ;;  %vm117_vm0 = vcmask 130048   ;;  %vm357_vm1 = vcmask 1040384  }
  0x17   :  { %v106_v2 = vld [vmem:[#allocation7 + $0x38] sm:$0xff]  ;;  %135 = vmatpush.msra.mxu1 %v103_v0  ;;  %175 = vmatpush.msra.mxu2 %v105_v1  ;;  %v99_v3 = vld [vmem:[#allocation7] sm:$0xff]  ;;  %v101_v4 = vld [vmem:[#allocation7 + $0x10] sm:$0xff]  ;;  %vm359_vm2 = vcmask 1042434   ;;  %vm361_vm3 = vcmask 1041408   ;;  %s2444_s23 = smov [#allocation13]  }
  0x18   :  { %v102_v5 = vld [vmem:[#allocation7 + $0x18] sm:$0xff]  ;;  %195 = vmatpush.msra.mxu3 %v106_v2  ;;  %v2495_v7 = vld [vmem:[#allocation9 + $0x1f0] sm:$0xff]  ;;  %v104_v11 = vld [vmem:[#allocation7 + $0x28] sm:$0xff]  ;;  %s2096_s24 = sshll.u32 %s2444_s23, 4  ;;  %s2098_s27 = sshll.u32 %s3531_s6, 4  ;;  %s2097_s24 = int_to_ptr.vmem [resolvable:$true] %s2096_s24  ;;  %s2099_s27 = int_to_ptr.hbm [resolvable:$true] %s2098_s27 }
  0x19   :  { %v98_v6 = vld [vmem:[#allocation4] sm:$0xff]  ;;  %136 = vmatpush.msra.mxu1 %v99_v3  ;;  %176 = vmatpush.msra.mxu2 %v101_v4  ;;  %v2500_v9 = vld [vmem:[#allocation9 + $0x1d0] sm:$0xff]  ;;  %v2512_v14 = vld [vmem:[#allocation9 + $0x1e0] sm:$0xff] }
  0x1a   :  { %v2497_v8 = vld [vmem:[#allocation9 + $0x1f8] sm:$0xff]  ;;  %196 = vmatpush.msra.mxu3 %v102_v5  ;;  %2110 = vmatmul.msk.f32.vlgmr.msra.gmra.mxu1 %vm117_vm0, %v98_v6  ;;  %v2508_v12 = vld [vmem:[#allocation9 + $0x1b0] sm:$0xff]  ;;  %v100_v15 = vld [vmem:[#allocation7 + $0x8] sm:$0xff]  ;;  %v2443_v5 = vmov 0.0  }
  0x1b   :  { %v2502_v10 = vld [vmem:[#allocation9 + $0x1d8] sm:$0xff]  ;;  %310 = vmatpush.msrb.mxu2 %v2495_v7  ;;  %2113 = vmatmul.msk.f32.vlgmr.msra.gmra.mxu3 %vm117_vm0, %v98_v6  ;;  %v2516_v16 = vld [vmem:[#allocation9 + $0x1c0] sm:$0xff]  ;;  %v2518_v17 = vld [vmem:[#allocation9 + $0x1e8] sm:$0xff] }
  0x1c   :  { %330 = vmatpush.msrb.mxu3 %v2497_v8  ;;  %2112 = vmatmul.msk.f32.vlgmr.msra.gmra.mxu2 %vm117_vm0, %v98_v6  ;;  %v2510_v13 = vld [vmem:[#allocation9 + $0x1b8] sm:$0xff]  ;;  %v2520_v18 = vld [vmem:[#allocation9 + $0x190] sm:$0xff]  ;;  %v2527_v20 = vld [vmem:[#allocation9 + $0x1c8] sm:$0xff] }
  0x1d   :  { %311 = vmatpush.msrb.mxu2 %v2500_v9  ;;  %155 = vmatpush.msrb.mxu1 %v104_v11  ;;  %v2525_v19 = vld [vmem:[#allocation9 + $0x198] sm:$0xff]  ;;  %v2529_v21 = vld [vmem:[#allocation9 + $0x170] sm:$0xff]  ;;  %v2536_v23 = vld [vmem:[#allocation9 + $0x1a0] sm:$0xff] }
  0x1e   :  { %331 = vmatpush.msrb.mxu3 %v2502_v10  ;;  %270 = vmatpush.msra.mxu0 %v2512_v14  ;;  %v2534_v22 = vld [vmem:[#allocation9 + $0x178] sm:$0xff]  ;;  %v2540_v24 = vld [vmem:[#allocation9 + $0x1a8] sm:$0xff]  ;;  %v2542_v25 = vld [vmem:[#allocation9 + $0x150] sm:$0xff] }
  0x1f   :  { %312 = vmatpush.msrb.mxu2 %v2508_v12  ;;  %156 = vmatpush.msrb.mxu1 %v100_v15  ;;  %v2546_v26 = vld [vmem:[#allocation9 + $0x158] sm:$0xff]  ;;  %v2548_v27 = vld [vmem:[#allocation9 + $0x180] sm:$0xff]  ;;  %v2552_v28 = vld [vmem:[#allocation9 + $0x188] sm:$0xff] }
  0x20   :  { %332 = vmatpush.msrb.mxu3 %v2510_v13  ;;  %271 = vmatpush.msra.mxu0 %v2516_v16  ;;  %v2554_v29 = vld [vmem:[#allocation9 + $0x130] sm:$0xff]  ;;  %v2558_v30 = vld [vmem:[#allocation9 + $0x138] sm:$0xff]  ;;  %v2560_v31 = vld [vmem:[#allocation9 + $0x160] sm:$0xff] }
  0x21   :  { %290 = vmatpush.msra.mxu1 %v2518_v17  ;;  %313 = vmatpush.msrb.mxu2 %v2520_v18  ;;  %v2564_v32 = vld [vmem:[#allocation9 + $0x168] sm:$0xff]  ;;  %v2566_v33 = vld [vmem:[#allocation9 + $0x110] sm:$0xff]  ;;  %v2570_v34 = vld [vmem:[#allocation9 + $0x118] sm:$0xff] }
  0x22   :  { %333 = vmatpush.msrb.mxu3 %v2525_v19  ;;  %2111 = vmatmul.msk.f32.vlgmr.msrb.gmra.mxu1 %vm117_vm0, %v98_v6  ;;  %v2572_v35 = vld [vmem:[#allocation9 + $0x140] sm:$0xff]  ;;  %v2576_v36 = vld [vmem:[#allocation9 + $0x148] sm:$0xff]  ;;  %v2578_v37 = vld [vmem:[#allocation9 + $0xf0] sm:$0xff] }
  0x23   :  { %291 = vmatpush.msra.mxu1 %v2527_v20  ;;  %314 = vmatpush.msrb.mxu2 %v2529_v21  ;;  %v2582_v38 = vld [vmem:[#allocation9 + $0xf8] sm:$0xff]  ;;  %v2584_v39 = vld [vmem:[#allocation9 + $0x120] sm:$0xff]  ;;  %v2588_v40 = vld [vmem:[#allocation9 + $0x128] sm:$0xff] }
  0x24   :  { %334 = vmatpush.msrb.mxu3 %v2534_v22  ;;  %272 = vmatpush.msra.mxu0 %v2536_v23  ;;  %v2590_v41 = vld [vmem:[#allocation9 + $0xd0] sm:$0xff]  ;;  %v2594_v42 = vld [vmem:[#allocation9 + $0xd8] sm:$0xff]  ;;  %v2596_v43 = vld [vmem:[#allocation9 + $0x100] sm:$0xff] }
  0x25   :  { %292 = vmatpush.msra.mxu1 %v2540_v24  ;;  %315 = vmatpush.msrb.mxu2 %v2542_v25  ;;  %v2600_v44 = vld [vmem:[#allocation9 + $0x108] sm:$0xff]  ;;  %v2602_v45 = vld [vmem:[#allocation9 + $0xb0] sm:$0xff]  ;;  %v2606_v46 = vld [vmem:[#allocation9 + $0xb8] sm:$0xff] }
  0x26   :  { %335 = vmatpush.msrb.mxu3 %v2546_v26  ;;  %273 = vmatpush.msra.mxu0 %v2548_v27  ;;  %v2608_v47 = vld [vmem:[#allocation9 + $0xe0] sm:$0xff]  ;;  %v2612_v48 = vld [vmem:[#allocation9 + $0xe8] sm:$0xff]  ;;  %v2614_v49 = vld [vmem:[#allocation9 + $0x90] sm:$0xff] }
  0x27   :  { %293 = vmatpush.msra.mxu1 %v2552_v28  ;;  %316 = vmatpush.msrb.mxu2 %v2554_v29  ;;  %v2618_v50 = vld [vmem:[#allocation9 + $0x98] sm:$0xff]  ;;  %v2620_v51 = vld [vmem:[#allocation9 + $0xc0] sm:$0xff]  ;;  %v2624_v52 = vld [vmem:[#allocation9 + $0xc8] sm:$0xff] }
  0x28   :  { %336 = vmatpush.msrb.mxu3 %v2558_v30  ;;  %274 = vmatpush.msra.mxu0 %v2560_v31  ;;  %v2626_v53 = vld [vmem:[#allocation9 + $0x70] sm:$0xff]  ;;  %v2630_v54 = vld [vmem:[#allocation9 + $0x78] sm:$0xff]  ;;  %v2632_v55 = vld [vmem:[#allocation9 + $0xa0] sm:$0xff] }
  0x29   :  { %294 = vmatpush.msra.mxu1 %v2564_v32  ;;  %317 = vmatpush.msrb.mxu2 %v2566_v33  ;;  %v2636_v56 = vld [vmem:[#allocation9 + $0xa8] sm:$0xff]  ;;  %v2638_v57 = vld [vmem:[#allocation9 + $0x50] sm:$0xff]  ;;  %v2642_v58 = vld [vmem:[#allocation9 + $0x58] sm:$0xff] }
  0x2a   :  { %337 = vmatpush.msrb.mxu3 %v2570_v34  ;;  %275 = vmatpush.msra.mxu0 %v2572_v35  ;;  %v2644_v59 = vld [vmem:[#allocation9 + $0x80] sm:$0xff]  ;;  %v2648_v60 = vld [vmem:[#allocation9 + $0x88] sm:$0xff]  ;;  %v2650_v61 = vld [vmem:[#allocation9 + $0x30] sm:$0xff] }
  0x2b   :  { %295 = vmatpush.msra.mxu1 %v2576_v36  ;;  %318 = vmatpush.msrb.mxu2 %v2578_v37  ;;  %v2654_v62 = vld [vmem:[#allocation9 + $0x38] sm:$0xff]  ;;  %v2656_v63 = vld [vmem:[#allocation9 + $0x60] sm:$0xff]  ;;  %v2660_v0 = vld [vmem:[#allocation9 + $0x68] sm:$0xff] }
  0x2c   :  { %338 = vmatpush.msrb.mxu3 %v2582_v38  ;;  %276 = vmatpush.msra.mxu0 %v2584_v39  ;;  %v2662_v1 = vld [vmem:[#allocation9 + $0x10] sm:$0xff]  ;;  %v2666_v2 = vld [vmem:[#allocation9 + $0x18] sm:$0xff]  ;;  %v2670_v3 = vld [vmem:[#allocation9 + $0x48] sm:$0xff] }
  0x2d   :  { %296 = vmatpush.msra.mxu1 %v2588_v40  ;;  %319 = vmatpush.msrb.mxu2 %v2590_v41  ;;  %3567 = vst [vmem:[#allocation18_spill] sm:$0xff] %v2662_v1  ;;  %v2674_v4 = vld [vmem:[#allocation9 + $0x40] sm:$0xff]  ;;  %v2677_v6 = vld [vmem:[#allocation9 + $0x28] sm:$0xff] }
  0x2e   :  { %339 = vmatpush.msrb.mxu3 %v2594_v42  ;;  %277 = vmatpush.msra.mxu0 %v2596_v43  ;;  %v2680_v11 = vld [vmem:[#allocation9 + $0x20] sm:$0xff]  ;;  %v2683_v15 = vld [vmem:[#allocation9 + $0x8] sm:$0xff] }
  0x2f   :  { %297 = vmatpush.msra.mxu1 %v2600_v44  ;;  %320 = vmatpush.msrb.mxu2 %v2602_v45 }
  0x30   :  { %340 = vmatpush.msrb.mxu3 %v2606_v46  ;;  %278 = vmatpush.msra.mxu0 %v2608_v47 }
  0x31   :  { %298 = vmatpush.msra.mxu1 %v2612_v48  ;;  %321 = vmatpush.msrb.mxu2 %v2614_v49 }
  0x32   :  { %341 = vmatpush.msrb.mxu3 %v2618_v50  ;;  %279 = vmatpush.msra.mxu0 %v2620_v51 }
  0x33   :  { %299 = vmatpush.msra.mxu1 %v2624_v52  ;;  %322 = vmatpush.msrb.mxu2 %v2626_v53 }
  0x34   :  { %342 = vmatpush.msrb.mxu3 %v2630_v54  ;;  %280 = vmatpush.msra.mxu0 %v2632_v55 }
  0x35   :  { %300 = vmatpush.msra.mxu1 %v2636_v56  ;;  %323 = vmatpush.msrb.mxu2 %v2638_v57 }
  0x36   :  { %343 = vmatpush.msrb.mxu3 %v2642_v58  ;;  %281 = vmatpush.msra.mxu0 %v2644_v59 }
  0x37   :  { %301 = vmatpush.msra.mxu1 %v2648_v60  ;;  %324 = vmatpush.msrb.mxu2 %v2650_v61 }
  0x38   :  { %344 = vmatpush.msrb.mxu3 %v2654_v62  ;;  %282 = vmatpush.msra.mxu0 %v2656_v63 }
  0x39   :  { %302 = vmatpush.msra.mxu1 %v2660_v0  ;;  %325 = vmatpush.msrb.mxu2 %v2662_v1  ;;  %v2687_v1 = vld [vmem:[#allocation9] sm:$0xff] }
  0x3a   :  { %345 = vmatpush.msrb.mxu3 %v2666_v2  ;;  %326 = vmatmul.f32.vlgmr.msrb.gmra.mxu2 %v2443_v5 }
  0x3b   :  { %346 = vmatmul.f32.vlgmr.msrb.gmra.mxu3 %v2443_v5  ;;  %303 = vmatpush.msra.mxu1 %v2670_v3 }
  0x3c   :  { %283 = vmatpush.msra.mxu0 %v2674_v4  ;;  %542 = vmatpush.msra.mxu2 %v2495_v7 }
  0x3d   :  { %304 = vmatpush.msra.mxu1 %v2677_v6  ;;  %562 = vmatpush.msra.mxu3 %v2497_v8 }
  0x3e   :  { %284 = vmatpush.msra.mxu0 %v2680_v11  ;;  %543 = vmatpush.msra.mxu2 %v2500_v9 }
  0x3f   :  { %305 = vmatpush.msra.mxu1 %v2683_v15  ;;  %563 = vmatpush.msra.mxu3 %v2502_v10 }
  0x40   :  { %306 = vmatmul.f32.vlgmr.msra.gmra.mxu1 %v2443_v5  ;;  %285 = vmatpush.msra.mxu0 %v2687_v1 }
  0x41   :  { %286 = vmatmul.f32.vlgmr.msra.gmra.mxu0 %v2443_v5  ;;  %522 = vmatpush.msrb.mxu1 %v2518_v17  ;;  %v3568_v5 = vld [vmem:[#allocation18_spill] sm:$0xff] }
  0x42   :  { %502 = vmatpush.msrb.mxu0 %v2512_v14  ;;  %544 = vmatpush.msra.mxu2 %v2508_v12 }
  0x43   :  { %523 = vmatpush.msrb.mxu1 %v2527_v20  ;;  %564 = vmatpush.msra.mxu3 %v2510_v13 }
  0x44   :  { %503 = vmatpush.msrb.mxu0 %v2516_v16  ;;  %545 = vmatpush.msra.mxu2 %v2520_v18 }
  0x45   :  { %524 = vmatpush.msrb.mxu1 %v2540_v24  ;;  %565 = vmatpush.msra.mxu3 %v2525_v19 }
  0x46   :  { %504 = vmatpush.msrb.mxu0 %v2536_v23  ;;  %546 = vmatpush.msra.mxu2 %v2529_v21 }
  0x47   :  { %525 = vmatpush.msrb.mxu1 %v2552_v28  ;;  %566 = vmatpush.msra.mxu3 %v2534_v22 }
  0x48   :  { %505 = vmatpush.msrb.mxu0 %v2548_v27  ;;  %547 = vmatpush.msra.mxu2 %v2542_v25 }
  0x49   :  { %526 = vmatpush.msrb.mxu1 %v2564_v32  ;;  %567 = vmatpush.msra.mxu3 %v2546_v26 }
  0x4a   :  { %506 = vmatpush.msrb.mxu0 %v2560_v31  ;;  %548 = vmatpush.msra.mxu2 %v2554_v29 }
  0x4b   :  { %527 = vmatpush.msrb.mxu1 %v2576_v36  ;;  %568 = vmatpush.msra.mxu3 %v2558_v30 }
  0x4c   :  { %507 = vmatpush.msrb.mxu0 %v2572_v35  ;;  %549 = vmatpush.msra.mxu2 %v2566_v33 }
  0x4d   :  { %528 = vmatpush.msrb.mxu1 %v2588_v40  ;;  %569 = vmatpush.msra.mxu3 %v2570_v34 }
  0x4e   :  { %508 = vmatpush.msrb.mxu0 %v2584_v39  ;;  %550 = vmatpush.msra.mxu2 %v2578_v37 }
  0x4f   :  { %529 = vmatpush.msrb.mxu1 %v2600_v44  ;;  %570 = vmatpush.msra.mxu3 %v2582_v38 }
  0x50   :  { %509 = vmatpush.msrb.mxu0 %v2596_v43  ;;  %551 = vmatpush.msra.mxu2 %v2590_v41 }
  0x51   :  { %530 = vmatpush.msrb.mxu1 %v2612_v48  ;;  %571 = vmatpush.msra.mxu3 %v2594_v42 }
  0x52   :  { %510 = vmatpush.msrb.mxu0 %v2608_v47  ;;  %552 = vmatpush.msra.mxu2 %v2602_v45 }
  0x53   :  { %531 = vmatpush.msrb.mxu1 %v2624_v52  ;;  %572 = vmatpush.msra.mxu3 %v2606_v46 }
  0x54   :  { %511 = vmatpush.msrb.mxu0 %v2620_v51  ;;  %553 = vmatpush.msra.mxu2 %v2614_v49 }
  0x55   :  { %532 = vmatpush.msrb.mxu1 %v2636_v56  ;;  %573 = vmatpush.msra.mxu3 %v2618_v50 }
  0x56   :  { %512 = vmatpush.msrb.mxu0 %v2632_v55  ;;  %554 = vmatpush.msra.mxu2 %v2626_v53 }
  0x57   :  { %533 = vmatpush.msrb.mxu1 %v2648_v60  ;;  %574 = vmatpush.msra.mxu3 %v2630_v54 }
  0x58   :  { %513 = vmatpush.msrb.mxu0 %v2644_v59  ;;  %555 = vmatpush.msra.mxu2 %v2638_v57 }
  0x59   :  { %534 = vmatpush.msrb.mxu1 %v2660_v0  ;;  %575 = vmatpush.msra.mxu3 %v2642_v58 }
  0x5a   :  { %514 = vmatpush.msrb.mxu0 %v2656_v63  ;;  %556 = vmatpush.msra.mxu2 %v2650_v61 }
  0x5b   :  { %535 = vmatpush.msrb.mxu1 %v2670_v3  ;;  %576 = vmatpush.msra.mxu3 %v2654_v62 }
  0x5c   :  { %515 = vmatpush.msrb.mxu0 %v2674_v4  ;;  %557 = vmatpush.msra.mxu2 %v3568_v5 }
  0x5d   :  { %536 = vmatpush.msrb.mxu1 %v2677_v6  ;;  %577 = vmatpush.msra.mxu3 %v2666_v2 }
  0x5e   :  { %516 = vmatpush.msrb.mxu0 %v2680_v11  ;;  %771 = vmatpush.msrb.mxu2 %v2495_v7  ;;  %v107_v7 = vld [vmem:[#allocation10] sm:$0xf] }
  0x5f   :  { %537 = vmatpush.msrb.mxu1 %v2683_v15  ;;  %791 = vmatpush.msrb.mxu3 %v2497_v8  ;;  %v109_v8 = vperm.slane %v107_v7, 0 }
  0x60   :  { %517 = vmatpush.msrb.mxu0 %v2687_v1  ;;  %772 = vmatpush.msrb.mxu2 %v2500_v9 }
  0x61   :  { %751 = vmatpush.msra.mxu1 %v2518_v17  ;;  %792 = vmatpush.msrb.mxu3 %v2502_v10 }
  0x62   :  { %731 = vmatpush.msra.mxu0 %v2512_v14  ;;  %773 = vmatpush.msrb.mxu2 %v2508_v12  ;;  %v110_v12 = vperm.slane %v107_v7, 1  ;;  %v112_v14 = vperm.slane %v107_v7, 3 }
  0x63   :  { %752 = vmatpush.msra.mxu1 %v2527_v20  ;;  %793 = vmatpush.msrb.mxu3 %v2510_v13  ;;  %v111_v13 = vperm.slane %v107_v7, 2 }
  0x64   :  { %732 = vmatpush.msra.mxu0 %v2516_v16  ;;  %774 = vmatpush.msrb.mxu2 %v2520_v18 }
  0x65   :  { %753 = vmatpush.msra.mxu1 %v2540_v24  ;;  %794 = vmatpush.msrb.mxu3 %v2525_v19 }
  0x66   :  { %733 = vmatpush.msra.mxu0 %v2536_v23  ;;  %775 = vmatpush.msrb.mxu2 %v2529_v21 }
  0x67   :  { %754 = vmatpush.msra.mxu1 %v2552_v28  ;;  %795 = vmatpush.msrb.mxu3 %v2534_v22 }
  0x68   :  { %734 = vmatpush.msra.mxu0 %v2548_v27  ;;  %776 = vmatpush.msrb.mxu2 %v2542_v25 }
  0x69   :  { %755 = vmatpush.msra.mxu1 %v2564_v32  ;;  %796 = vmatpush.msrb.mxu3 %v2546_v26 }
  0x6a   :  { %735 = vmatpush.msra.mxu0 %v2560_v31  ;;  %777 = vmatpush.msrb.mxu2 %v2554_v29 }
  0x6b   :  { %756 = vmatpush.msra.mxu1 %v2576_v36  ;;  %797 = vmatpush.msrb.mxu3 %v2558_v30 }
  0x6c   :  { %736 = vmatpush.msra.mxu0 %v2572_v35  ;;  %778 = vmatpush.msrb.mxu2 %v2566_v33 }
  0x6d   :  { %757 = vmatpush.msra.mxu1 %v2588_v40  ;;  %798 = vmatpush.msrb.mxu3 %v2570_v34 }
  0x6e   :  { %737 = vmatpush.msra.mxu0 %v2584_v39  ;;  %779 = vmatpush.msrb.mxu2 %v2578_v37 }
  0x6f   :  { %758 = vmatpush.msra.mxu1 %v2600_v44  ;;  %799 = vmatpush.msrb.mxu3 %v2582_v38 }
  0x70   :  { %738 = vmatpush.msra.mxu0 %v2596_v43  ;;  %780 = vmatpush.msrb.mxu2 %v2590_v41 }
  0x71   :  { %759 = vmatpush.msra.mxu1 %v2612_v48  ;;  %800 = vmatpush.msrb.mxu3 %v2594_v42 }
  0x72   :  { %739 = vmatpush.msra.mxu0 %v2608_v47  ;;  %781 = vmatpush.msrb.mxu2 %v2602_v45 }
  0x73   :  { %760 = vmatpush.msra.mxu1 %v2624_v52  ;;  %801 = vmatpush.msrb.mxu3 %v2606_v46 }
  0x74   :  { %740 = vmatpush.msra.mxu0 %v2620_v51  ;;  %782 = vmatpush.msrb.mxu2 %v2614_v49 }
  0x75   :  { %761 = vmatpush.msra.mxu1 %v2636_v56  ;;  %802 = vmatpush.msrb.mxu3 %v2618_v50 }
  0x76   :  { %741 = vmatpush.msra.mxu0 %v2632_v55  ;;  %783 = vmatpush.msrb.mxu2 %v2626_v53 }
  0x77   :  { %762 = vmatpush.msra.mxu1 %v2648_v60  ;;  %803 = vmatpush.msrb.mxu3 %v2630_v54 }
  0x78   :  { %742 = vmatpush.msra.mxu0 %v2644_v59  ;;  %784 = vmatpush.msrb.mxu2 %v2638_v57 }
  0x79   :  { %763 = vmatpush.msra.mxu1 %v2660_v0  ;;  %804 = vmatpush.msrb.mxu3 %v2642_v58 }
  0x7a   :  { %743 = vmatpush.msra.mxu0 %v2656_v63  ;;  %785 = vmatpush.msrb.mxu2 %v2650_v61 }
  0x7b   :  { %764 = vmatpush.msra.mxu1 %v2670_v3  ;;  %805 = vmatpush.msrb.mxu3 %v2654_v62 }
  0x7c   :  { %744 = vmatpush.msra.mxu0 %v2674_v4  ;;  %786 = vmatpush.msrb.mxu2 %v3568_v5 }
  0x7d   :  { %765 = vmatpush.msra.mxu1 %v2677_v6  ;;  %806 = vmatpush.msrb.mxu3 %v2666_v2 }
  0x7e   :  { %745 = vmatpush.msra.mxu0 %v2680_v11 }
  0x7f   :  { %766 = vmatpush.msra.mxu1 %v2683_v15 }
  0x80   :  { %746 = vmatpush.msra.mxu0 %v2687_v1 }
  0x97   :  { %v138_v9 = vpop.f32.mrf.mxu1 }
  0x98   :  { %v139_v10 = vadd.f32 %v138_v9, %v109_v8 }
  0x9a   :  { %201 = vst [vmem:[#allocation2] sm:$0xff] %v139_v10 }
  0x9e   :  { %v198_v20 = vpop.f32.mrf.mxu3 }
  0x9f   :  { %v158_v16 = vpop.f32.mrf.mxu1  ;;  %v178_v17 = vpop.f32.mrf.mxu2  ;;  %v199_v21 = vadd.f32 %v198_v20, %v112_v14 }
  0xa0   :  { %v159_v18 = vadd.f32 %v158_v16, %v110_v12  ;;  %v179_v19 = vadd.f32 %v178_v17, %v111_v13 }
  0xa1   :  { %204 = vst [vmem:[#allocation2 + $0x18] sm:$0xff] %v199_v21 }
  0xa2   :  { %202 = vst [vmem:[#allocation2 + $0x8] sm:$0xff] %v159_v18 }
  0xa3   :  { %203 = vst [vmem:[#allocation2 + $0x10] sm:$0xff] %v179_v19 }
  0xaa   :  { %v205_v31 = vld [vmem:[#allocation2] ss:$8 sm:$0xf] }
  0xbd   :  { %v307_v22 = vpop.f32.mrf.mxu1  ;;  %v327_v23 = vpop.f32.mrf.mxu2 }
  0xbe   :  { %v354_v24 = vrot.slane %v307_v22, 7  ;;  %v355_v25 = vrot.slane %v327_v23, 6  ;;  %v347_v26 = vpop.f32.mrf.mxu3  ;;  %v287_v27 = vpop.f32.mrf.mxu0 }
  0xbf   :  { %v356_v28 = vrot.slane %v347_v26, 5 }
  0xc0   :  { %v358_v29 = vsel %vm357_vm1, %v287_v27, %v354_v24  ;;  %v437_v27 = vld [vmem:[#allocation2 + $0x1] ss:$8 sm:$0xf] }
  0xc1   :  { %v360_v30 = vsel %vm359_vm2, %v355_v25, %v356_v28 }
  0xc2   :  { %v362_v32 = vsel %vm361_vm3, %v358_v29, %v360_v30 }
  0xc3   :  { %v364_v33 = vadd.f32 %v362_v32, %v205_v31 }
  0xc5   :  { %v2114_v34 = vmul.f32 -1.442695, %v364_v33  ;;  %v385_v35 = vrot.slane %v364_v33, 1  ;;  %v409_v36 = vrot.slane %v364_v33, 3  ;;  %v406_v49 = vrot.slane %v364_v33, 2 }
  0xc7   :  { %2150 = vpow2.f32 %v2114_v34  ;;  %v2115_v37 = vmul.f32 -1.442695, %v385_v35  ;;  %v2116_v38 = vmul.f32 -1.442695, %v409_v36 }
  0xc9   :  { %2152 = vpow2.f32 %v2115_v37 }
  0xca   :  { %2154 = vpow2.f32 %v2116_v38 }
  0xcd   :  { %v2151_v39 = vpop.eup %2150 }
  0xce   :  { %v368_v40 = vadd.f32 1.0, %v2151_v39 }
  0xcf   :  { %v2153_v41 = vpop.eup %2152 }
  0xd0   :  { %v2155_v42 = vpop.eup %2154  ;;  %2156 = vrcp.f32 %v368_v40  ;;  %v390_v43 = vadd.f32 1.0, %v2153_v41  ;;  %v380_v53 = vand.u32 2147483648, %v368_v40  ;;  %v378_v55 = vand.u32 2147483647, %v368_v40 }
  0xd1   :  { %v414_v44 = vadd.f32 1.0, %v2155_v42  ;;  %vm374_vm5 = vweird.f32 %v368_v40 }
  0xd2   :  { %2158 = vrcp.f32 %v390_v43  ;;  %v402_v58 = vand.u32 2147483648, %v390_v43  ;;  %v400_v60 = vand.u32 2147483647, %v390_v43  ;;  %v381_v62 = vor.u32 1.1754944e-38, %v380_v53 }
  0xd3   :  { %2160 = vrcp.f32 %v414_v44  ;;  %vm379_vm8 = vcmp.eq.f32.partialorder %v378_v55, 8.507059e+37  ;;  %vm396_vm9 = vweird.f32 %v390_v43  ;;  %v426_v9 = vand.u32 2147483648, %v414_v44 }
  0xd4   :  { %2162 = vtanh.f32 %v406_v49  ;;  %v403_v2 = vor.u32 1.1754944e-38, %v402_v58  ;;  %vm401_vm11 = vcmp.eq.f32.partialorder %v400_v60, 8.507059e+37  ;;  %vm420_vm13 = vweird.f32 %v414_v44 }
  0xd5   :  { %v424_v10 = vand.u32 2147483647, %v414_v44  ;;  %v427_v13 = vor.u32 1.1754944e-38, %v426_v9 }
  0xd6   :  { %v2157_v45 = vpop.eup %2156 }
  0xd7   :  { %v370_v46 = vmul.f32 %v2157_v45, %v368_v40  ;;  %vm375_vm4 = vweird.f32 %v2157_v45  ;;  %vm425_vm15 = vcmp.eq.f32.partialorder %v424_v10, 8.507059e+37 }
  0xd8   :  { %v2159_v47 = vpop.eup %2158  ;;  %vm376_vm6 = vmor %vm374_vm5, %vm375_vm4 }
  0xd9   :  { %v371_v48 = vsub.f32 1.0, %v370_v46  ;;  %v2161_v50 = vpop.eup %2160  ;;  %v392_v51 = vmul.f32 %v2159_v47, %v390_v43  ;;  %vm397_vm7 = vweird.f32 %v2159_v47 }
  0xda   :  { %v416_v54 = vmul.f32 %v2161_v50, %v414_v44  ;;  %vm398_vm10 = vmor %vm396_vm9, %vm397_vm7  ;;  %v2163_v4 = vpop.eup %2162  ;;  %vm421_vm12 = vweird.f32 %v2161_v50 }
  0xdb   :  { %v372_v52 = vmul.f32 %v2157_v45, %v371_v48  ;;  %v393_v56 = vsub.f32 1.0, %v392_v51  ;;  %vm422_vm14 = vmor %vm420_vm13, %vm421_vm12 }
  0xdc   :  { %v417_v63 = vsub.f32 1.0, %v416_v54 }
  0xdd   :  { %v373_v57 = vadd.f32 %v2157_v45, %v372_v52  ;;  %v394_v59 = vmul.f32 %v2159_v47, %v393_v56 }
  0xde   :  { %v418_v11 = vmul.f32 %v2161_v50, %v417_v63 }
  0xdf   :  { %v377_v61 = vsel %vm376_vm6, %v2157_v45, %v373_v57  ;;  %v395_v0 = vadd.f32 %v2159_v47, %v394_v59 }
  0xe0   :  { %v382_v1 = vsel %vm379_vm8, %v381_v62, %v377_v61  ;;  %v419_v8 = vadd.f32 %v2161_v50, %v418_v11 }
  0xe1   :  { %v399_v3 = vsel %vm398_vm10, %v2159_v47, %v395_v0  ;;  %v431_v15 = vmul.f32 %v2163_v4, %v382_v1 }
  0xe2   :  { %v404_v6 = vsel %vm401_vm11, %v403_v2, %v399_v3  ;;  %v423_v12 = vsel %vm422_vm14, %v2161_v50, %v419_v8 }
  0xe3   :  { %v430_v5 = vmul.f32 0.0, %v404_v6  ;;  %v428_v16 = vsel %vm425_vm15, %v427_v13, %v423_v12 }
  0xe5   :  { %v2822_v7 = vadd.f32 %v431_v15, %v430_v5 }
  0xe7   :  { %2164 = vtanh.f32 %v2822_v7 }
  0xed   :  { %v2165_v14 = vpop.eup %2164 }
  0xee   :  { %v434_v17 = vmul.f32 %v2165_v14, %v428_v16  ;;  %v2834_v14 = vld [vmem:[#allocation9 + $0x1e8] sm:$0xff]  ;;  %v2836_v16 = vld [vmem:[#allocation9 + $0x1f0] sm:$0xff] }
  0xf0   :  { %435 = vst [vmem:[#allocation3] sm:$0x1] %v434_v17  ;;  %518 = vmatmul.f32.vlgmr.msrb.gmra.mxu0 %v434_v17  ;;  %538 = vmatmul.f32.vlgmr.msrb.gmra.mxu1 %v434_v17 }
  0xf1   :  { %558 = vmatmul.f32.vlgmr.msra.gmra.mxu2 %v434_v17  ;;  %578 = vmatmul.f32.vlgmr.msra.gmra.mxu3 %v434_v17  ;;  %v2840_v17 = vld [vmem:[#allocation9 + $0x1f8] sm:$0xff] }
  0xf2   :  { %980 = vmatpush.msrb.mxu1 %v2834_v14  ;;  %3569 = vst [vmem:[#allocation18_spill] sm:$0xff] %v2840_v17  ;;  %1000 = vmatpush.msra.mxu2 %v2836_v16 }
  0xf3   :  { %1020 = vmatpush.msra.mxu3 %v2840_v17 }
 0x16d   :  { %v539_v18 = vpop.f32.mrf.mxu1  ;;  %v519_v24 = vpop.f32.mrf.mxu0 }
 0x16e   :  { %v586_v19 = vrot.slane %v539_v18, 7  ;;  %v2844_v18 = vld [vmem:[#allocation9 + $0x1c0] sm:$0xff] }
 0x16f   :  { %3570 = vst [vmem:[#allocation19_spill] sm:$0xff] %v2844_v18 }
 0x170   :  { %v589_v25 = vsel %vm357_vm1, %v519_v24, %v586_v19  ;;  %v2846_v19 = vld [vmem:[#allocation9 + $0x1c8] sm:$0xff]  ;;  %v2860_v24 = vld [vmem:[#allocation9 + $0x1b0] sm:$0xff] }
 0x171   :  { %981 = vmatpush.msrb.mxu1 %v2846_v19  ;;  %3574 = vst [vmem:[#allocation23_spill] sm:$0xff] %v2860_v24 }
 0x174   :  { %v559_v20 = vpop.f32.mrf.mxu2  ;;  %v579_v21 = vpop.f32.mrf.mxu3 }
 0x175   :  { %v587_v22 = vrot.slane %v559_v20, 6  ;;  %v588_v23 = vrot.slane %v579_v21, 5  ;;  %v2848_v20 = vld [vmem:[#allocation9 + $0x1d0] sm:$0xff]  ;;  %v2852_v21 = vld [vmem:[#allocation9 + $0x1d8] sm:$0xff] }
 0x176   :  { %3571 = vst [vmem:[#allocation20_spill] sm:$0xff] %v2848_v20  ;;  %1001 = vmatpush.msra.mxu2 %v2848_v20  ;;  %1021 = vmatpush.msra.mxu3 %v2852_v21 }
 0x177   :  { %v590_v26 = vsel %vm359_vm2, %v587_v22, %v588_v23  ;;  %3572 = vst [vmem:[#allocation21_spill] sm:$0xff] %v2852_v21  ;;  %v2856_v22 = vld [vmem:[#allocation9 + $0x1a0] sm:$0xff]  ;;  %v2858_v23 = vld [vmem:[#allocation9 + $0x1a8] sm:$0xff] }
 0x178   :  { %v591_v28 = vsel %vm361_vm3, %v589_v25, %v590_v26  ;;  %3573 = vst [vmem:[#allocation22_spill] sm:$0xff] %v2856_v22  ;;  %982 = vmatpush.msrb.mxu1 %v2858_v23  ;;  %v2864_v25 = vld [vmem:[#allocation9 + $0x1b8] sm:$0xff]  ;;  %1002 = vmatpush.msra.mxu2 %v2860_v24  ;;  %v2868_v26 = vld [vmem:[#allocation9 + $0x180] sm:$0xff] }
 0x179   :  { %v593_v29 = vadd.f32 %v591_v28, %v437_v27  ;;  %3575 = vst [vmem:[#allocation24_spill] sm:$0xff] %v2864_v25  ;;  %1022 = vmatpush.msra.mxu3 %v2864_v25  ;;  %v2870_v27 = vld [vmem:[#allocation9 + $0x188] sm:$0xff]  ;;  %v2872_v28 = vld [vmem:[#allocation9 + $0x190] sm:$0xff] }
 0x17a   :  { %3576 = vst [vmem:[#allocation25_spill] sm:$0xff] %v2870_v27  ;;  %983 = vmatpush.msrb.mxu1 %v2870_v27  ;;  %1003 = vmatpush.msra.mxu2 %v2872_v28 }
 0x17b   :  { %v2117_v30 = vmul.f32 -1.442695, %v593_v29  ;;  %v614_v31 = vrot.slane %v593_v29, 1  ;;  %v638_v32 = vrot.slane %v593_v29, 3  ;;  %v635_v44 = vrot.slane %v593_v29, 2  ;;  %v2876_v29 = vld [vmem:[#allocation9 + $0x198] sm:$0xff] }
 0x17c   :  { %3577 = vst [vmem:[#allocation26_spill] sm:$0xff] %v2876_v29  ;;  %1023 = vmatpush.msra.mxu3 %v2876_v29 }
 0x17d   :  { %2166 = vpow2.f32 %v2117_v30  ;;  %v2118_v33 = vmul.f32 -1.442695, %v614_v31  ;;  %v2119_v34 = vmul.f32 -1.442695, %v638_v32  ;;  %v2880_v30 = vld [vmem:[#allocation9 + $0x160] sm:$0xff]  ;;  %v2882_v31 = vld [vmem:[#allocation9 + $0x168] sm:$0xff] }
 0x17e   :  { %3578 = vst [vmem:[#allocation27_spill] sm:$0xff] %v2880_v30  ;;  %v2884_v32 = vld [vmem:[#allocation9 + $0x170] sm:$0xff]  ;;  %984 = vmatpush.msrb.mxu1 %v2882_v31 }
 0x17f   :  { %2168 = vpow2.f32 %v2118_v33  ;;  %3579 = vst [vmem:[#allocation28_spill] sm:$0xff] %v2882_v31  ;;  %1004 = vmatpush.msra.mxu2 %v2884_v32 }
 0x180   :  { %2170 = vpow2.f32 %v2119_v34  ;;  %v2888_v34 = vld [vmem:[#allocation9 + $0x178] sm:$0xff] }
 0x181   :  { %1024 = vmatpush.msra.mxu3 %v2888_v34 }
 0x183   :  { %v2167_v35 = vpop.eup %2166 }
 0x184   :  { %v597_v36 = vadd.f32 1.0, %v2167_v35  ;;  %v2892_v35 = vld [vmem:[#allocation9 + $0x140] sm:$0xff] }
 0x185   :  { %v2169_v37 = vpop.eup %2168 }
 0x186   :  { %v2171_v38 = vpop.eup %2170  ;;  %2172 = vrcp.f32 %v597_v36  ;;  %v619_v39 = vadd.f32 1.0, %v2169_v37  ;;  %v609_v48 = vand.u32 2147483648, %v597_v36  ;;  %v607_v52 = vand.u32 2147483647, %v597_v36  ;;  %v2896_v37 = vld [vmem:[#allocation9 + $0x150] sm:$0xff] }
 0x187   :  { %v643_v40 = vadd.f32 1.0, %v2171_v38  ;;  %vm603_vm4 = vweird.f32 %v597_v36  ;;  %v2900_v38 = vld [vmem:[#allocation9 + $0x158] sm:$0xff]  ;;  %1005 = vmatpush.msra.mxu2 %v2896_v37 }
 0x188   :  { %2174 = vrcp.f32 %v619_v39  ;;  %v631_v53 = vand.u32 2147483648, %v619_v39  ;;  %v629_v56 = vand.u32 2147483647, %v619_v39  ;;  %v610_v57 = vor.u32 1.1754944e-38, %v609_v48  ;;  %1025 = vmatpush.msra.mxu3 %v2900_v38  ;;  %v2918_v48 = vld [vmem:[#allocation9 + $0x110] sm:$0xff] }
 0x189   :  { %2176 = vrcp.f32 %v643_v40  ;;  %vm608_vm7 = vcmp.eq.f32.partialorder %v607_v52, 8.507059e+37  ;;  %vm625_vm8 = vweird.f32 %v619_v39  ;;  %v655_v15 = vand.u32 2147483648, %v643_v40  ;;  %v2924_v52 = vld [vmem:[#allocation9 + $0xe0] sm:$0xff] }
 0x18a   :  { %2178 = vtanh.f32 %v635_v44  ;;  %v632_v62 = vor.u32 1.1754944e-38, %v631_v53  ;;  %vm630_vm10 = vcmp.eq.f32.partialorder %v629_v56, 8.507059e+37  ;;  %vm649_vm12 = vweird.f32 %v643_v40  ;;  %v2912_v44 = vld [vmem:[#allocation9 + $0x100] sm:$0xff]  ;;  %v2926_v53 = vld [vmem:[#allocation9 + $0xe8] sm:$0xff]  ;;  %v2932_v56 = vld [vmem:[#allocation9 + $0xf8] sm:$0xff] }
 0x18b   :  { %v653_v5 = vand.u32 2147483647, %v643_v40  ;;  %v656_v9 = vor.u32 1.1754944e-38, %v655_v15 }
 0x18c   :  { %v2173_v41 = vpop.eup %2172 }
 0x18d   :  { %v599_v42 = vmul.f32 %v2173_v41, %v597_v36  ;;  %vm604_vm0 = vweird.f32 %v2173_v41  ;;  %vm654_vm14 = vcmp.eq.f32.partialorder %v653_v5, 8.507059e+37  ;;  %v2894_v36 = vld [vmem:[#allocation9 + $0x148] sm:$0xff] }
 0x18e   :  { %v2175_v43 = vpop.eup %2174  ;;  %vm605_vm6 = vmor %vm603_vm4, %vm604_vm0  ;;  %3580 = vst [vmem:[#allocation29_spill] sm:$0xff] %v2894_v36  ;;  %985 = vmatpush.msrb.mxu1 %v2894_v36 }
 0x18f   :  { %v2177_v45 = vpop.eup %2176  ;;  %v600_v46 = vsub.f32 1.0, %v599_v42  ;;  %v621_v47 = vmul.f32 %v2175_v43, %v619_v39  ;;  %vm626_vm5 = vweird.f32 %v2175_v43  ;;  %v2902_v39 = vld [vmem:[#allocation9 + $0x120] sm:$0xff]  ;;  %v2908_v42 = vld [vmem:[#allocation9 + $0x130] sm:$0xff] }
 0x190   :  { %v645_v49 = vmul.f32 %v2177_v45, %v643_v40  ;;  %vm627_vm9 = vmor %vm625_vm8, %vm626_vm5  ;;  %v2179_v0 = vpop.eup %2178  ;;  %vm650_vm11 = vweird.f32 %v2177_v45  ;;  %v2904_v40 = vld [vmem:[#allocation9 + $0x128] sm:$0xff]  ;;  %1006 = vmatpush.msra.mxu2 %v2908_v42 }
 0x191   :  { %v622_v50 = vsub.f32 1.0, %v621_v47  ;;  %v601_v51 = vmul.f32 %v2173_v41, %v600_v46  ;;  %vm651_vm13 = vmor %vm649_vm12, %vm650_vm11  ;;  %986 = vmatpush.msrb.mxu1 %v2904_v40  ;;  %v2916_v47 = vld [vmem:[#allocation9 + $0x108] sm:$0xff] }
 0x192   :  { %v646_v58 = vsub.f32 1.0, %v645_v49  ;;  %v2920_v49 = vld [vmem:[#allocation9 + $0x118] sm:$0xff]  ;;  %1007 = vmatpush.msra.mxu2 %v2918_v48 }
 0x193   :  { %v602_v54 = vadd.f32 %v2173_v41, %v601_v51  ;;  %v623_v55 = vmul.f32 %v2175_v43, %v622_v50  ;;  %987 = vmatpush.msrb.mxu1 %v2916_v47 }
 0x194   :  { %v647_v2 = vmul.f32 %v2177_v45, %v646_v58 }
 0x195   :  { %v606_v59 = vsel %vm605_vm6, %v2173_v41, %v602_v54  ;;  %v624_v60 = vadd.f32 %v2175_v43, %v623_v55  ;;  %v2930_v55 = vld [vmem:[#allocation9 + $0xf0] sm:$0xff]  ;;  %988 = vmatpush.msrb.mxu1 %v2926_v53 }
 0x196   :  { %v611_v61 = vsel %vm608_vm7, %v610_v57, %v606_v59  ;;  %v648_v11 = vadd.f32 %v2177_v45, %v647_v2  ;;  %v2938_v59 = vld [vmem:[#allocation9 + $0xc0] sm:$0xff]  ;;  %1008 = vmatpush.msra.mxu2 %v2930_v55 }
 0x197   :  { %v628_v63 = vsel %vm627_vm9, %v2175_v43, %v624_v60  ;;  %v660_v4 = vmul.f32 %v2179_v0, %v611_v61  ;;  %v2910_v43 = vld [vmem:[#allocation9 + $0x138] sm:$0xff]  ;;  %v2940_v60 = vld [vmem:[#allocation9 + $0xc8] sm:$0xff]  ;;  %v2953_v2 = vld [vmem:[#allocation9 + $0xa0] sm:$0xff] }
 0x198   :  { %v633_v1 = vsel %vm630_vm10, %v632_v62, %v628_v63  ;;  %v652_v8 = vsel %vm651_vm13, %v2177_v45, %v648_v11  ;;  %1026 = vmatpush.msra.mxu3 %v2910_v43  ;;  %v666_v61 = vld [vmem:[#allocation2 + $0x2] ss:$8 sm:$0xf]  ;;  %989 = vmatpush.msrb.mxu1 %v2940_v60 }
 0x199   :  { %v659_v3 = vmul.f32 %v633_v1, %v2822_v7  ;;  %v657_v12 = vsel %vm654_vm14, %v656_v9, %v652_v8  ;;  %v2832_v7 = vld [vmem:[#allocation9 + $0x1e0] sm:$0xff]  ;;  %v2945_v63 = vld [vmem:[#allocation9 + $0xd0] sm:$0xff]  ;;  %v2947_v0 = vld [vmem:[#allocation9 + $0xd8] sm:$0xff] }
 0x19a   :  { %960 = vmatpush.msrb.mxu0 %v2832_v7  ;;  %1027 = vmatpush.msra.mxu3 %v2920_v49  ;;  %v2961_v11 = vld [vmem:[#allocation9 + $0xb8] sm:$0xff]  ;;  %v2968_v9 = vld [vmem:[#allocation9 + $0x80] sm:$0xff] }
 0x19b   :  { %v2829_v6 = vadd.f32 %v660_v4, %v659_v3  ;;  %v2955_v3 = vld [vmem:[#allocation9 + $0xa8] sm:$0xff]  ;;  %v2959_v4 = vld [vmem:[#allocation9 + $0xb0] sm:$0xff]  ;;  %1009 = vmatpush.msra.mxu2 %v2945_v63 }
 0x19c   :  { %961 = vmatpush.msrb.mxu0 %v2844_v18  ;;  %1028 = vmatpush.msra.mxu3 %v2932_v56 }
 0x19d   :  { %2180 = vtanh.f32 %v2829_v6  ;;  %990 = vmatpush.msrb.mxu1 %v2955_v3  ;;  %1010 = vmatpush.msra.mxu2 %v2959_v4 }
 0x19e   :  { %962 = vmatpush.msrb.mxu0 %v2856_v22  ;;  %1029 = vmatpush.msra.mxu3 %v2947_v0 }
 0x1a0   :  { %963 = vmatpush.msrb.mxu0 %v2868_v26  ;;  %1030 = vmatpush.msra.mxu3 %v2961_v11 }
 0x1a2   :  { %964 = vmatpush.msrb.mxu0 %v2880_v30 }
 0x1a3   :  { %v2181_v10 = vpop.eup %2180 }
 0x1a4   :  { %v663_v13 = vmul.f32 %v2181_v10, %v657_v12  ;;  %965 = vmatpush.msrb.mxu0 %v2892_v35  ;;  %v2970_v10 = vld [vmem:[#allocation9 + $0x88] sm:$0xff]  ;;  %v2974_v12 = vld [vmem:[#allocation9 + $0x90] sm:$0xff] }
 0x1a5   :  { %991 = vmatpush.msrb.mxu1 %v2970_v10  ;;  %1011 = vmatpush.msra.mxu2 %v2974_v12 }
 0x1a6   :  { %664 = vst [vmem:[#allocation3 + $0x1] sm:$0x1] %v663_v13  ;;  %747 = vmatmul.f32.vlgmr.msra.gmra.mxu0 %v663_v13  ;;  %767 = vmatmul.f32.vlgmr.msra.gmra.mxu1 %v663_v13 }
 0x1a7   :  { %787 = vmatmul.f32.vlgmr.msrb.gmra.mxu2 %v663_v13  ;;  %807 = vmatmul.f32.vlgmr.msrb.gmra.mxu3 %v663_v13  ;;  %v2976_v13 = vld [vmem:[#allocation9 + $0x98] sm:$0xff] }
 0x1a8   :  { %966 = vmatpush.msrb.mxu0 %v2902_v39  ;;  %1031 = vmatpush.msra.mxu3 %v2976_v13 }
 0x1aa   :  { %967 = vmatpush.msrb.mxu0 %v2912_v44 }
 0x1ac   :  { %968 = vmatpush.msrb.mxu0 %v2924_v52 }
 0x1ae   :  { %969 = vmatpush.msrb.mxu0 %v2938_v59 }
 0x1b0   :  { %970 = vmatpush.msrb.mxu0 %v2953_v2 }
 0x1b2   :  { %971 = vmatpush.msrb.mxu0 %v2968_v9 }
 0x223   :  { %v768_v33 = vpop.f32.mrf.mxu1  ;;  %v748_v54 = vpop.f32.mrf.mxu0 }
 0x224   :  { %v815_v41 = vrot.slane %v768_v33, 7 }
 0x226   :  { %v818_v57 = vsel %vm357_vm1, %v748_v54, %v815_v41  ;;  %v2992_v54 = vld [vmem:[#allocation9 + $0x40] sm:$0xff] }
 0x227   :  { %3584 = vst [vmem:[#allocation33_spill] sm:$0xff] %v2992_v54 }
 0x22a   :  { %v788_v45 = vpop.f32.mrf.mxu2  ;;  %v808_v46 = vpop.f32.mrf.mxu3 }
 0x22b   :  { %v816_v50 = vrot.slane %v788_v45, 6  ;;  %v817_v51 = vrot.slane %v808_v46, 5  ;;  %v2980_v45 = vld [vmem:[#allocation9 + $0x60] sm:$0xff]  ;;  %v2982_v46 = vld [vmem:[#allocation9 + $0x68] sm:$0xff] }
 0x22c   :  { %3581 = vst [vmem:[#allocation30_spill] sm:$0xff] %v2982_v46  ;;  %972 = vmatpush.msrb.mxu0 %v2980_v45  ;;  %992 = vmatpush.msrb.mxu1 %v2982_v46 }
 0x22d   :  { %v819_v58 = vsel %vm359_vm2, %v816_v50, %v817_v51  ;;  %v2986_v50 = vld [vmem:[#allocation9 + $0x70] sm:$0xff]  ;;  %v2988_v51 = vld [vmem:[#allocation9 + $0x78] sm:$0xff] }
 0x22e   :  { %v820_v62 = vsel %vm361_vm3, %v818_v57, %v819_v58  ;;  %3582 = vst [vmem:[#allocation31_spill] sm:$0xff] %v2986_v50  ;;  %v2994_v57 = vld [vmem:[#allocation9 + $0x48] sm:$0xff]  ;;  %v2998_v58 = vld [vmem:[#allocation9 + $0x50] sm:$0xff]  ;;  %1012 = vmatpush.msra.mxu2 %v2986_v50  ;;  %1032 = vmatpush.msra.mxu3 %v2988_v51 }
 0x22f   :  { %v2949_v1 = vadd.f32 %v820_v62, %v666_v61  ;;  %3583 = vst [vmem:[#allocation32_spill] sm:$0xff] %v2988_v51  ;;  %v3000_v61 = vld [vmem:[#allocation9 + $0x58] sm:$0xff]  ;;  %v3004_v62 = vld [vmem:[#allocation9 + $0x20] sm:$0xff]  ;;  %973 = vmatpush.msrb.mxu0 %v2992_v54  ;;  %993 = vmatpush.msrb.mxu1 %v2994_v57  ;;  %v3018_v51 = vld [vmem:[#allocation9 + $0x8] sm:$0xff] }
 0x230   :  { %3585 = vst [vmem:[#allocation34_spill] sm:$0xff] %v2994_v57  ;;  %1013 = vmatpush.msra.mxu2 %v2998_v58  ;;  %1033 = vmatpush.msra.mxu3 %v3000_v61  ;;  %v3024_v57 = vld [vmem:[#allocation9 + $0x10] sm:$0xff]  ;;  %v3026_v54 = vld [vmem:[#allocation9 + $0x18] sm:$0xff] }
 0x231   :  { %v2120_v15 = vmul.f32 -1.442695, %v2949_v1  ;;  %v843_v5 = vrot.slane %v2949_v1, 1  ;;  %v867_v8 = vrot.slane %v2949_v1, 3  ;;  %3586 = vst [vmem:[#allocation35_spill] sm:$0xff] %v2998_v58  ;;  %974 = vmatpush.msrb.mxu0 %v3004_v62 }
 0x232   :  { %3587 = vst [vmem:[#allocation36_spill] sm:$0xff] %v3000_v61 }
 0x233   :  { %2182 = vpow2.f32 %v2120_v15  ;;  %v2121_v33 = vmul.f32 -1.442695, %v843_v5  ;;  %v2122_v41 = vmul.f32 -1.442695, %v867_v8  ;;  %v3006_v15 = vld [vmem:[#allocation9 + $0x28] sm:$0xff]  ;;  %v3010_v5 = vld [vmem:[#allocation9 + $0x30] sm:$0xff] }
 0x234   :  { %v3012_v8 = vld [vmem:[#allocation9 + $0x38] sm:$0xff]  ;;  %994 = vmatpush.msrb.mxu1 %v3006_v15  ;;  %1014 = vmatpush.msra.mxu2 %v3010_v5 }
 0x235   :  { %2184 = vpow2.f32 %v2121_v33  ;;  %1034 = vmatpush.msra.mxu3 %v3012_v8 }
 0x236   :  { %2186 = vpow2.f32 %v2122_v41  ;;  %v3016_v41 = vld [vmem:[#allocation9] sm:$0xff]  ;;  %995 = vmatpush.msrb.mxu1 %v3018_v51  ;;  %1015 = vmatpush.msra.mxu2 %v3024_v57 }
 0x237   :  { %975 = vmatpush.msrb.mxu0 %v3016_v41  ;;  %1035 = vmatpush.msra.mxu3 %v3026_v54 }
 0x238   :  { %1209 = vmatpush.msra.mxu1 %v2834_v14  ;;  %1229 = vmatpush.msrb.mxu2 %v2836_v16 }
 0x239   :  { %v2183_v33 = vpop.eup %2182  ;;  %1189 = vmatpush.msra.mxu0 %v2832_v7  ;;  %1249 = vmatpush.msrb.mxu3 %v2840_v17 }
 0x23a   :  { %v3020_v50 = vadd.f32 1.0, %v2183_v33  ;;  %1210 = vmatpush.msra.mxu1 %v2846_v19  ;;  %1230 = vmatpush.msrb.mxu2 %v2848_v20 }
 0x23b   :  { %v2185_v46 = vpop.eup %2184  ;;  %1190 = vmatpush.msra.mxu0 %v2844_v18  ;;  %1250 = vmatpush.msrb.mxu3 %v2852_v21  ;;  %v864_v18 = vrot.slane %v2949_v1, 2 }
 0x23c   :  { %v2187_v61 = vpop.eup %2186  ;;  %2188 = vrcp.f32 %v3020_v50  ;;  %v3031_v58 = vadd.f32 1.0, %v2185_v46  ;;  %1211 = vmatpush.msra.mxu1 %v2858_v23  ;;  %1231 = vmatpush.msrb.mxu2 %v2860_v24  ;;  %v838_v24 = vand.u32 2147483648, %v3020_v50  ;;  %vm832_vm0 = vweird.f32 %v3020_v50 }
 0x23d   :  { %v3035_v33 = vadd.f32 1.0, %v2187_v61  ;;  %1191 = vmatpush.msra.mxu0 %v2856_v22  ;;  %1251 = vmatpush.msrb.mxu3 %v2864_v25 }
 0x23e   :  { %2190 = vrcp.f32 %v3031_v58  ;;  %1212 = vmatpush.msra.mxu1 %v2870_v27  ;;  %1232 = vmatpush.msrb.mxu2 %v2872_v28  ;;  %vm854_vm7 = vweird.f32 %v3031_v58 }
 0x23f   :  { %2192 = vrcp.f32 %v3035_v33  ;;  %1192 = vmatpush.msra.mxu0 %v2868_v26  ;;  %1252 = vmatpush.msrb.mxu3 %v2876_v29  ;;  %v860_v29 = vand.u32 2147483648, %v3031_v58  ;;  %vm878_vm11 = vweird.f32 %v3035_v33 }
 0x240   :  { %1213 = vmatpush.msra.mxu1 %v2882_v31  ;;  %1233 = vmatpush.msrb.mxu2 %v2884_v32  ;;  %2194 = vtanh.f32 %v864_v18  ;;  %v839_v18 = vor.u32 1.1754944e-38, %v838_v24 }
 0x241   :  { %1193 = vmatpush.msra.mxu0 %v2880_v30  ;;  %1253 = vmatpush.msrb.mxu3 %v2888_v34 }
 0x242   :  { %v2189_v46 = vpop.eup %2188  ;;  %1214 = vmatpush.msra.mxu1 %v2894_v36  ;;  %1234 = vmatpush.msrb.mxu2 %v2896_v37 }
 0x243   :  { %v828_v61 = vmul.f32 %v2189_v46, %v3020_v50  ;;  %vm833_vm15 = vweird.f32 %v2189_v46  ;;  %1194 = vmatpush.msra.mxu0 %v2892_v35  ;;  %1254 = vmatpush.msrb.mxu3 %v2900_v38 }
 0x244   :  { %v2191_v17 = vpop.eup %2190  ;;  %vm834_vm5 = vmor %vm832_vm0, %vm833_vm15  ;;  %1215 = vmatpush.msra.mxu1 %v2904_v40  ;;  %1235 = vmatpush.msrb.mxu2 %v2908_v42 }
 0x245   :  { %v3057_v20 = vpop.eup %2192  ;;  %v829_v21 = vsub.f32 1.0, %v828_v61  ;;  %v850_v22 = vmul.f32 %v2191_v17, %v3031_v58  ;;  %v836_v61 = vand.u32 2147483647, %v3020_v50  ;;  %vm855_vm4 = vweird.f32 %v2191_v17  ;;  %1195 = vmatpush.msra.mxu0 %v2902_v39  ;;  %1255 = vmatpush.msrb.mxu3 %v2910_v43 }
 0x246   :  { %v874_v25 = vmul.f32 %v3057_v20, %v3035_v33  ;;  %vm856_vm8 = vmor %vm854_vm7, %vm855_vm4  ;;  %1216 = vmatpush.msra.mxu1 %v2916_v47  ;;  %1236 = vmatpush.msrb.mxu2 %v2918_v48  ;;  %vm879_vm10 = vweird.f32 %v3057_v20 }
 0x247   :  { %v851_v1 = vsub.f32 1.0, %v850_v22  ;;  %v830_v27 = vmul.f32 %v2189_v46, %v829_v21  ;;  %v858_v21 = vand.u32 2147483647, %v3031_v58  ;;  %vm837_vm6 = vcmp.eq.f32.partialorder %v836_v61, 8.507059e+37  ;;  %1196 = vmatpush.msra.mxu0 %v2912_v44  ;;  %1256 = vmatpush.msrb.mxu3 %v2920_v49  ;;  %vm880_vm12 = vmor %vm878_vm11, %vm879_vm10 }
 0x248   :  { %v875_v22 = vsub.f32 1.0, %v874_v25  ;;  %v2195_v25 = vpop.eup %2194  ;;  %1217 = vmatpush.msra.mxu1 %v2926_v53  ;;  %1237 = vmatpush.msrb.mxu2 %v2930_v55 }
 0x249   :  { %v831_v30 = vadd.f32 %v2189_v46, %v830_v27  ;;  %v852_v31 = vmul.f32 %v2191_v17, %v851_v1  ;;  %v861_v1 = vor.u32 1.1754944e-38, %v860_v29  ;;  %vm859_vm9 = vcmp.eq.f32.partialorder %v858_v21, 8.507059e+37  ;;  %1197 = vmatpush.msra.mxu0 %v2924_v52  ;;  %1257 = vmatpush.msrb.mxu3 %v2932_v56  ;;  %v3588_v21 = vld [vmem:[#allocation30_spill] sm:$0xff] }
 0x24a   :  { %1218 = vmatpush.msra.mxu1 %v2940_v60  ;;  %1238 = vmatpush.msrb.mxu2 %v2945_v63 }
 0x24b   :  { %v835_v50 = vsel %vm834_vm5, %v2189_v46, %v831_v30  ;;  %v853_v36 = vadd.f32 %v2191_v17, %v852_v31  ;;  %v876_v31 = vmul.f32 %v3057_v20, %v875_v22  ;;  %1198 = vmatpush.msra.mxu0 %v2938_v59  ;;  %1258 = vmatpush.msrb.mxu3 %v2947_v0  ;;  %v882_v46 = vand.u32 2147483647, %v3035_v33  ;;  %v3589_v22 = vld [vmem:[#allocation31_spill] sm:$0xff] }
 0x24c   :  { %v840_v27 = vsel %vm837_vm6, %v839_v18, %v835_v50  ;;  %1219 = vmatpush.msra.mxu1 %v2955_v3  ;;  %1239 = vmatpush.msrb.mxu2 %v2959_v4  ;;  %v3590_v50 = vld [vmem:[#allocation32_spill] sm:$0xff] }
 0x24d   :  { %v857_v24 = vsel %vm856_vm8, %v2191_v17, %v853_v36  ;;  %v889_v58 = vmul.f32 %v2195_v25, %v840_v27  ;;  %v877_v36 = vadd.f32 %v3057_v20, %v876_v31  ;;  %1199 = vmatpush.msra.mxu0 %v2953_v2  ;;  %1259 = vmatpush.msrb.mxu3 %v2961_v11  ;;  %vm883_vm13 = vcmp.eq.f32.partialorder %v882_v46, 8.507059e+37  ;;  %v3592_v27 = vld [vmem:[#allocation34_spill] sm:$0xff]  ;;  %v3593_v25 = vld [vmem:[#allocation35_spill] sm:$0xff] }
 0x24e   :  { %v862_v30 = vsel %vm859_vm9, %v861_v1, %v857_v24  ;;  %1220 = vmatpush.msra.mxu1 %v2970_v10  ;;  %1240 = vmatpush.msrb.mxu2 %v2974_v12  ;;  %v3595_v31 = vld [vmem:[#allocation18_spill] sm:$0xff]  ;;  %v3600_v46 = vld [vmem:[#allocation23_spill] sm:$0xff] }
 0x24f   :  { %v888_v29 = vmul.f32 %v862_v30, %v2829_v6  ;;  %v884_v6 = vand.u32 2147483648, %v3035_v33  ;;  %1200 = vmatpush.msra.mxu0 %v2968_v9  ;;  %1260 = vmatpush.msrb.mxu3 %v2976_v13  ;;  %v881_v61 = vsel %vm880_vm12, %v3057_v20, %v877_v36  ;;  %v3591_v33 = vld [vmem:[#allocation33_spill] sm:$0xff]  ;;  %v3594_v30 = vld [vmem:[#allocation36_spill] sm:$0xff] }
 0x250   :  { %1221 = vmatpush.msra.mxu1 %v3588_v21  ;;  %1241 = vmatpush.msrb.mxu2 %v3589_v22  ;;  %v3598_v36 = vld [vmem:[#allocation21_spill] sm:$0xff] }
 0x251   :  { %v3096_v17 = vadd.f32 %v889_v58, %v888_v29  ;;  %1201 = vmatpush.msra.mxu0 %v2980_v45  ;;  %v885_v18 = vor.u32 1.1754944e-38, %v884_v6  ;;  %1261 = vmatpush.msrb.mxu3 %v3590_v50  ;;  %v3596_v29 = vld [vmem:[#allocation19_spill] sm:$0xff]  ;;  %v3597_v58 = vld [vmem:[#allocation20_spill] sm:$0xff]  ;;  %v3599_v6 = vld [vmem:[#allocation22_spill] sm:$0xff] }
 0x252   :  { %1222 = vmatpush.msra.mxu1 %v3592_v27  ;;  %1242 = vmatpush.msrb.mxu2 %v3593_v25 }
 0x253   :  { %2196 = vtanh.f32 %v3096_v17  ;;  %1202 = vmatpush.msra.mxu0 %v3591_v33  ;;  %v886_v24 = vsel %vm883_vm13, %v885_v18, %v881_v61  ;;  %1262 = vmatpush.msrb.mxu3 %v3594_v30  ;;  %v3605_v61 = vld [vmem:[#allocation28_spill] sm:$0xff] }
 0x254   :  { %1223 = vmatpush.msra.mxu1 %v3006_v15  ;;  %1243 = vmatpush.msrb.mxu2 %v3010_v5 }
 0x255   :  { %1203 = vmatpush.msra.mxu0 %v3004_v62  ;;  %1263 = vmatpush.msrb.mxu3 %v3012_v8 }
 0x256   :  { %1224 = vmatpush.msra.mxu1 %v3018_v51  ;;  %1244 = vmatpush.msrb.mxu2 %v3024_v57 }
 0x257   :  { %1204 = vmatpush.msra.mxu0 %v3016_v41  ;;  %1264 = vmatpush.msrb.mxu3 %v3026_v54 }
 0x259   :  { %v2197_v1 = vpop.eup %2196 }
 0x25a   :  { %v892_v20 = vmul.f32 %v2197_v1, %v886_v24 }
 0x25c   :  { %893 = vst [vmem:[#allocation3 + $0x2] sm:$0x1] %v892_v20  ;;  %976 = vmatmul.f32.vlgmr.msrb.gmra.mxu0 %v892_v20  ;;  %996 = vmatmul.f32.vlgmr.msrb.gmra.mxu1 %v892_v20 }
 0x25d   :  { %1016 = vmatmul.f32.vlgmr.msra.gmra.mxu2 %v892_v20  ;;  %1036 = vmatmul.f32.vlgmr.msra.gmra.mxu3 %v892_v20 }
 0x25e   :  { %1418 = vmatpush.msrb.mxu0 %v2832_v7  ;;  %1438 = vmatpush.msrb.mxu1 %v2834_v14  ;;  %v3601_v7 = vld [vmem:[#allocation24_spill] sm:$0xff]  ;;  %v3602_v14 = vld [vmem:[#allocation25_spill] sm:$0xff] }
 0x25f   :  { %1458 = vmatpush.msra.mxu2 %v2836_v16  ;;  %1478 = vmatpush.msra.mxu3 %v3595_v31  ;;  %v3603_v16 = vld [vmem:[#allocation26_spill] sm:$0xff] }
 0x260   :  { %1419 = vmatpush.msrb.mxu0 %v3596_v29  ;;  %1439 = vmatpush.msrb.mxu1 %v2846_v19  ;;  %v3604_v19 = vld [vmem:[#allocation27_spill] sm:$0xff] }
 0x261   :  { %1459 = vmatpush.msra.mxu2 %v3597_v58  ;;  %1479 = vmatpush.msra.mxu3 %v3598_v36 }
 0x262   :  { %1420 = vmatpush.msrb.mxu0 %v3599_v6  ;;  %1440 = vmatpush.msrb.mxu1 %v2858_v23  ;;  %v3606_v23 = vld [vmem:[#allocation29_spill] sm:$0xff] }
 0x263   :  { %1460 = vmatpush.msra.mxu2 %v3600_v46  ;;  %1480 = vmatpush.msra.mxu3 %v3601_v7 }
 0x264   :  { %1421 = vmatpush.msrb.mxu0 %v2868_v26  ;;  %1441 = vmatpush.msrb.mxu1 %v3602_v14 }
 0x265   :  { %1461 = vmatpush.msra.mxu2 %v2872_v28  ;;  %1481 = vmatpush.msra.mxu3 %v3603_v16 }
 0x266   :  { %1422 = vmatpush.msrb.mxu0 %v3604_v19  ;;  %1442 = vmatpush.msrb.mxu1 %v3605_v61 }
 0x267   :  { %1462 = vmatpush.msra.mxu2 %v2884_v32  ;;  %1482 = vmatpush.msra.mxu3 %v2888_v34 }
 0x268   :  { %1423 = vmatpush.msrb.mxu0 %v2892_v35  ;;  %1443 = vmatpush.msrb.mxu1 %v3606_v23 }
 0x269   :  { %1463 = vmatpush.msra.mxu2 %v2896_v37  ;;  %1483 = vmatpush.msra.mxu3 %v2900_v38 }
 0x26a   :  { %1424 = vmatpush.msrb.mxu0 %v2902_v39  ;;  %1444 = vmatpush.msrb.mxu1 %v2904_v40 }
 0x26b   :  { %1464 = vmatpush.msra.mxu2 %v2908_v42  ;;  %1484 = vmatpush.msra.mxu3 %v2910_v43  ;;  %v895_v42 = vld [vmem:[#allocation2 + $0x3] ss:$8 sm:$0xf] }
 0x26c   :  { %1425 = vmatpush.msrb.mxu0 %v2912_v44  ;;  %1445 = vmatpush.msrb.mxu1 %v2916_v47 }
 0x26d   :  { %1465 = vmatpush.msra.mxu2 %v2918_v48  ;;  %1485 = vmatpush.msra.mxu3 %v2920_v49 }
 0x26e   :  { %1426 = vmatpush.msrb.mxu0 %v2924_v52  ;;  %1446 = vmatpush.msrb.mxu1 %v2926_v53 }
 0x26f   :  { %1466 = vmatpush.msra.mxu2 %v2930_v55  ;;  %1486 = vmatpush.msra.mxu3 %v2932_v56 }
 0x270   :  { %1427 = vmatpush.msrb.mxu0 %v2938_v59  ;;  %1447 = vmatpush.msrb.mxu1 %v2940_v60 }
 0x271   :  { %1467 = vmatpush.msra.mxu2 %v2945_v63  ;;  %1487 = vmatpush.msra.mxu3 %v2947_v0 }
 0x272   :  { %1428 = vmatpush.msrb.mxu0 %v2953_v2  ;;  %1448 = vmatpush.msrb.mxu1 %v2955_v3 }
 0x273   :  { %1468 = vmatpush.msra.mxu2 %v2959_v4  ;;  %1488 = vmatpush.msra.mxu3 %v2961_v11 }
 0x274   :  { %1429 = vmatpush.msrb.mxu0 %v2968_v9  ;;  %1449 = vmatpush.msrb.mxu1 %v2970_v10 }
 0x275   :  { %1469 = vmatpush.msra.mxu2 %v2974_v12  ;;  %1489 = vmatpush.msra.mxu3 %v2976_v13 }
 0x276   :  { %1430 = vmatpush.msrb.mxu0 %v2980_v45  ;;  %1450 = vmatpush.msrb.mxu1 %v3588_v21 }
 0x277   :  { %1470 = vmatpush.msra.mxu2 %v3589_v22  ;;  %1490 = vmatpush.msra.mxu3 %v3590_v50 }
 0x278   :  { %1431 = vmatpush.msrb.mxu0 %v3591_v33  ;;  %1451 = vmatpush.msrb.mxu1 %v3592_v27 }
 0x279   :  { %1471 = vmatpush.msra.mxu2 %v3593_v25  ;;  %1491 = vmatpush.msra.mxu3 %v3594_v30 }
 0x27a   :  { %1432 = vmatpush.msrb.mxu0 %v3004_v62  ;;  %1452 = vmatpush.msrb.mxu1 %v3006_v15 }
 0x27b   :  { %1472 = vmatpush.msra.mxu2 %v3010_v5  ;;  %1492 = vmatpush.msra.mxu3 %v3012_v8 }
 0x27c   :  { %1433 = vmatpush.msrb.mxu0 %v3016_v41  ;;  %1453 = vmatpush.msrb.mxu1 %v3018_v51 }
 0x27d   :  { %1473 = vmatpush.msra.mxu2 %v3024_v57  ;;  %1493 = vmatpush.msra.mxu3 %v3026_v54 }
 0x2d9   :  { %v997_v26 = vpop.f32.mrf.mxu1  ;;  %v977_v38 = vpop.f32.mrf.mxu0 }
 0x2da   :  { %v1044_v28 = vrot.slane %v997_v26, 7 }
 0x2dc   :  { %v1047_v39 = vsel %vm357_vm1, %v977_v38, %v1044_v28 }
 0x2e0   :  { %v1017_v32 = vpop.f32.mrf.mxu2  ;;  %v1037_v34 = vpop.f32.mrf.mxu3 }
 0x2e1   :  { %v1045_v35 = vrot.slane %v1017_v32, 6  ;;  %v1046_v37 = vrot.slane %v1037_v34, 5 }
 0x2e3   :  { %v1048_v40 = vsel %vm359_vm2, %v1045_v35, %v1046_v37  ;;  %v1124_v37 = vld [vmem:[#allocation2 + $0x4] ss:$8 sm:$0xf] }
 0x2e4   :  { %v1049_v43 = vsel %vm361_vm3, %v1047_v39, %v1048_v40 }
 0x2e5   :  { %v1051_v44 = vadd.f32 %v1049_v43, %v895_v42 }
 0x2e7   :  { %v2123_v47 = vmul.f32 -1.442695, %v1051_v44  ;;  %v1072_v48 = vrot.slane %v1051_v44, 1  ;;  %v1096_v49 = vrot.slane %v1051_v44, 3  ;;  %v1093_v11 = vrot.slane %v1051_v44, 2 }
 0x2e9   :  { %2198 = vpow2.f32 %v2123_v47  ;;  %v2124_v52 = vmul.f32 -1.442695, %v1072_v48  ;;  %v2125_v53 = vmul.f32 -1.442695, %v1096_v49 }
 0x2eb   :  { %2200 = vpow2.f32 %v2124_v52 }
 0x2ec   :  { %2202 = vpow2.f32 %v2125_v53 }
 0x2ef   :  { %v2199_v55 = vpop.eup %2198 }
 0x2f0   :  { %v1055_v56 = vadd.f32 1.0, %v2199_v55 }
 0x2f1   :  { %v2201_v59 = vpop.eup %2200 }
 0x2f2   :  { %v2203_v60 = vpop.eup %2202  ;;  %2204 = vrcp.f32 %v1055_v56  ;;  %v1077_v63 = vadd.f32 1.0, %v2201_v59  ;;  %v1067_v13 = vand.u32 2147483648, %v1055_v56  ;;  %v1065_v57 = vand.u32 2147483647, %v1055_v56 }
 0x2f3   :  { %v1101_v0 = vadd.f32 1.0, %v2203_v60  ;;  %vm1061_vm15 = vweird.f32 %v1055_v56 }
 0x2f4   :  { %2206 = vrcp.f32 %v1077_v63  ;;  %v1089_v62 = vand.u32 2147483648, %v1077_v63  ;;  %v1087_v8 = vand.u32 2147483647, %v1077_v63  ;;  %v1068_v41 = vor.u32 1.1754944e-38, %v1067_v13 }
 0x2f5   :  { %2208 = vrcp.f32 %v1101_v0  ;;  %vm1066_vm5 = vcmp.eq.f32.partialorder %v1065_v57, 8.507059e+37  ;;  %vm1083_vm6 = vweird.f32 %v1077_v63  ;;  %v1113_v58 = vand.u32 2147483648, %v1101_v0 }
 0x2f6   :  { %2210 = vtanh.f32 %v1093_v11  ;;  %v1090_v33 = vor.u32 1.1754944e-38, %v1089_v62  ;;  %vm1088_vm8 = vcmp.eq.f32.partialorder %v1087_v8, 8.507059e+37  ;;  %vm1107_vm10 = vweird.f32 %v1101_v0 }
 0x2f7   :  { %v1111_v36 = vand.u32 2147483647, %v1101_v0  ;;  %v1114_v46 = vor.u32 1.1754944e-38, %v1113_v58 }
 0x2f8   :  { %v2205_v2 = vpop.eup %2204 }
 0x2f9   :  { %v1057_v3 = vmul.f32 %v2205_v2, %v1055_v56  ;;  %vm1062_vm14 = vweird.f32 %v2205_v2  ;;  %vm1112_vm12 = vcmp.eq.f32.partialorder %v1111_v36, 8.507059e+37 }
 0x2fa   :  { %v2207_v4 = vpop.eup %2206  ;;  %vm1063_vm4 = vmor %vm1061_vm15, %vm1062_vm14 }
 0x2fb   :  { %v2209_v9 = vpop.eup %2208  ;;  %v1058_v10 = vsub.f32 1.0, %v1057_v3  ;;  %v1079_v12 = vmul.f32 %v2207_v4, %v1077_v63  ;;  %vm1084_vm0 = vweird.f32 %v2207_v4 }
 0x2fc   :  { %v1103_v45 = vmul.f32 %v2209_v9, %v1101_v0  ;;  %vm1085_vm7 = vmor %vm1083_vm6, %vm1084_vm0  ;;  %v2211_v1 = vpop.eup %2210  ;;  %vm1108_vm9 = vweird.f32 %v2209_v9 }
 0x2fd   :  { %v1080_v51 = vsub.f32 1.0, %v1079_v12  ;;  %v1059_v54 = vmul.f32 %v2205_v2, %v1058_v10  ;;  %vm1109_vm11 = vmor %vm1107_vm10, %vm1108_vm9 }
 0x2fe   :  { %v1104_v21 = vsub.f32 1.0, %v1103_v45 }
 0x2ff   :  { %v1060_v15 = vadd.f32 %v2205_v2, %v1059_v54  ;;  %v1081_v5 = vmul.f32 %v2207_v4, %v1080_v51 }
 0x300   :  { %v1105_v25 = vmul.f32 %v2209_v9, %v1104_v21 }
 0x301   :  { %v1064_v18 = vsel %vm1063_vm4, %v2205_v2, %v1060_v15  ;;  %v1082_v22 = vadd.f32 %v2207_v4, %v1081_v5 }
 0x302   :  { %v1069_v50 = vsel %vm1066_vm5, %v1068_v41, %v1064_v18  ;;  %v1106_v29 = vadd.f32 %v2209_v9, %v1105_v25 }
 0x303   :  { %v1086_v27 = vsel %vm1085_vm7, %v2207_v4, %v1082_v22  ;;  %v1118_v20 = vmul.f32 %v2211_v1, %v1069_v50 }
 0x304   :  { %v1091_v24 = vsel %vm1088_vm8, %v1090_v33, %v1086_v27  ;;  %v1110_v6 = vsel %vm1109_vm11, %v2209_v9, %v1106_v29 }
 0x305   :  { %v1117_v30 = vmul.f32 %v1091_v24, %v3096_v17  ;;  %v1115_v14 = vsel %vm1112_vm12, %v1114_v46, %v1110_v6 }
 0x307   :  { %v3199_v31 = vadd.f32 %v1118_v20, %v1117_v30 }
 0x309   :  { %2212 = vtanh.f32 %v3199_v31 }
 0x30f   :  { %v2213_v7 = vpop.eup %2212 }
 0x310   :  { %v1121_v16 = vmul.f32 %v2213_v7, %v1115_v14  ;;  %v3211_v7 = vld [vmem:[#allocation9 + $0x1e8] sm:$0xff]  ;;  %v3213_v14 = vld [vmem:[#allocation9 + $0x1f0] sm:$0xff] }
 0x312   :  { %1122 = vst [vmem:[#allocation3 + $0x3] sm:$0x1] %v1121_v16  ;;  %1205 = vmatmul.f32.vlgmr.msra.gmra.mxu0 %v1121_v16  ;;  %1225 = vmatmul.f32.vlgmr.msra.gmra.mxu1 %v1121_v16 }
 0x313   :  { %1245 = vmatmul.f32.vlgmr.msrb.gmra.mxu2 %v1121_v16  ;;  %1265 = vmatmul.f32.vlgmr.msrb.gmra.mxu3 %v1121_v16  ;;  %v3217_v16 = vld [vmem:[#allocation9 + $0x1f8] sm:$0xff] }
 0x314   :  { %1667 = vmatpush.msra.mxu1 %v3211_v7  ;;  %1687 = vmatpush.msrb.mxu2 %v3213_v14 }
 0x315   :  { %1707 = vmatpush.msrb.mxu3 %v3217_v16 }
 0x38f   :  { %v1226_v17 = vpop.f32.mrf.mxu1  ;;  %v1206_v32 = vpop.f32.mrf.mxu0 }
 0x390   :  { %v1273_v19 = vrot.slane %v1226_v17, 7  ;;  %v3221_v17 = vld [vmem:[#allocation9 + $0x1c0] sm:$0xff] }
 0x392   :  { %v1276_v34 = vsel %vm357_vm1, %v1206_v32, %v1273_v19  ;;  %v3223_v19 = vld [vmem:[#allocation9 + $0x1c8] sm:$0xff]  ;;  %v3237_v32 = vld [vmem:[#allocation9 + $0x1b0] sm:$0xff] }
 0x393   :  { %1668 = vmatpush.msra.mxu1 %v3223_v19 }
 0x396   :  { %v1246_v61 = vpop.f32.mrf.mxu2  ;;  %v1266_v23 = vpop.f32.mrf.mxu3 }
 0x397   :  { %v1274_v26 = vrot.slane %v1246_v61, 6  ;;  %v1275_v28 = vrot.slane %v1266_v23, 5  ;;  %v3225_v61 = vld [vmem:[#allocation9 + $0x1d0] sm:$0xff]  ;;  %v3229_v23 = vld [vmem:[#allocation9 + $0x1d8] sm:$0xff] }
 0x398   :  { %1688 = vmatpush.msrb.mxu2 %v3225_v61  ;;  %1708 = vmatpush.msrb.mxu3 %v3229_v23 }
 0x399   :  { %v1277_v35 = vsel %vm359_vm2, %v1274_v26, %v1275_v28  ;;  %v3233_v26 = vld [vmem:[#allocation9 + $0x1a0] sm:$0xff]  ;;  %v3235_v28 = vld [vmem:[#allocation9 + $0x1a8] sm:$0xff] }
 0x39a   :  { %v1278_v38 = vsel %vm361_vm3, %v1276_v34, %v1277_v35  ;;  %1669 = vmatpush.msra.mxu1 %v3235_v28  ;;  %v3241_v34 = vld [vmem:[#allocation9 + $0x1b8] sm:$0xff]  ;;  %1689 = vmatpush.msrb.mxu2 %v3237_v32  ;;  %v3245_v35 = vld [vmem:[#allocation9 + $0x180] sm:$0xff] }
 0x39b   :  { %v1280_v39 = vadd.f32 %v1278_v38, %v1124_v37  ;;  %1709 = vmatpush.msrb.mxu3 %v3241_v34  ;;  %v3247_v37 = vld [vmem:[#allocation9 + $0x188] sm:$0xff]  ;;  %v3249_v38 = vld [vmem:[#allocation9 + $0x190] sm:$0xff] }
 0x39c   :  { %1670 = vmatpush.msra.mxu1 %v3247_v37  ;;  %1690 = vmatpush.msrb.mxu2 %v3249_v38 }
 0x39d   :  { %v2126_v40 = vmul.f32 -1.442695, %v1280_v39  ;;  %v1301_v42 = vrot.slane %v1280_v39, 1  ;;  %v1325_v43 = vrot.slane %v1280_v39, 3  ;;  %v1322_v0 = vrot.slane %v1280_v39, 2  ;;  %v3253_v39 = vld [vmem:[#allocation9 + $0x198] sm:$0xff] }
 0x39e   :  { %1710 = vmatpush.msrb.mxu3 %v3253_v39 }
 0x39f   :  { %2214 = vpow2.f32 %v2126_v40  ;;  %v2127_v44 = vmul.f32 -1.442695, %v1301_v42  ;;  %v2128_v47 = vmul.f32 -1.442695, %v1325_v43  ;;  %v3257_v40 = vld [vmem:[#allocation9 + $0x160] sm:$0xff]  ;;  %v3259_v42 = vld [vmem:[#allocation9 + $0x168] sm:$0xff] }
 0x3a0   :  { %v3261_v43 = vld [vmem:[#allocation9 + $0x170] sm:$0xff]  ;;  %1671 = vmatpush.msra.mxu1 %v3259_v42 }
 0x3a1   :  { %2216 = vpow2.f32 %v2127_v44  ;;  %1691 = vmatpush.msrb.mxu2 %v3261_v43 }
 0x3a2   :  { %2218 = vpow2.f32 %v2128_v47  ;;  %v3265_v47 = vld [vmem:[#allocation9 + $0x178] sm:$0xff] }
 0x3a3   :  { %1711 = vmatpush.msrb.mxu3 %v3265_v47 }
 0x3a5   :  { %v2215_v48 = vpop.eup %2214 }
 0x3a6   :  { %v1284_v49 = vadd.f32 1.0, %v2215_v48  ;;  %v3269_v48 = vld [vmem:[#allocation9 + $0x140] sm:$0xff] }
 0x3a7   :  { %v2217_v52 = vpop.eup %2216 }
 0x3a8   :  { %v2219_v53 = vpop.eup %2218  ;;  %2220 = vrcp.f32 %v1284_v49  ;;  %v1306_v55 = vadd.f32 1.0, %v2217_v52  ;;  %v1296_v11 = vand.u32 2147483648, %v1284_v49  ;;  %v1294_v13 = vand.u32 2147483647, %v1284_v49  ;;  %v3273_v52 = vld [vmem:[#allocation9 + $0x150] sm:$0xff] }
 0x3a9   :  { %v1330_v56 = vadd.f32 1.0, %v2219_v53  ;;  %vm1290_vm14 = vweird.f32 %v1284_v49  ;;  %v3277_v53 = vld [vmem:[#allocation9 + $0x158] sm:$0xff]  ;;  %1692 = vmatpush.msrb.mxu2 %v3273_v52 }
 0x3aa   :  { %2222 = vrcp.f32 %v1306_v55  ;;  %v1318_v45 = vand.u32 2147483648, %v1306_v55  ;;  %v1316_v57 = vand.u32 2147483647, %v1306_v55  ;;  %v1297_v62 = vor.u32 1.1754944e-38, %v1296_v11  ;;  %1712 = vmatpush.msrb.mxu3 %v3277_v53  ;;  %v3295_v11 = vld [vmem:[#allocation9 + $0x110] sm:$0xff] }
 0x3ab   :  { %2224 = vrcp.f32 %v1330_v56  ;;  %vm1295_vm4 = vcmp.eq.f32.partialorder %v1294_v13, 8.507059e+37  ;;  %vm1312_vm5 = vweird.f32 %v1306_v55  ;;  %v1342_v30 = vand.u32 2147483648, %v1330_v56  ;;  %v3301_v13 = vld [vmem:[#allocation9 + $0xe0] sm:$0xff] }
 0x3ac   :  { %2226 = vtanh.f32 %v1322_v0  ;;  %v1319_v21 = vor.u32 1.1754944e-38, %v1318_v45  ;;  %vm1317_vm7 = vcmp.eq.f32.partialorder %v1316_v57, 8.507059e+37  ;;  %vm1336_vm9 = vweird.f32 %v1330_v56  ;;  %v3289_v0 = vld [vmem:[#allocation9 + $0x100] sm:$0xff]  ;;  %v3303_v45 = vld [vmem:[#allocation9 + $0xe8] sm:$0xff]  ;;  %v3309_v57 = vld [vmem:[#allocation9 + $0xf8] sm:$0xff] }
 0x3ad   :  { %v1340_v20 = vand.u32 2147483647, %v1330_v56  ;;  %v1343_v58 = vor.u32 1.1754944e-38, %v1342_v30 }
 0x3ae   :  { %v2221_v59 = vpop.eup %2220 }
 0x3af   :  { %v1286_v60 = vmul.f32 %v2221_v59, %v1284_v49  ;;  %vm1291_vm13 = vweird.f32 %v2221_v59  ;;  %vm1341_vm11 = vcmp.eq.f32.partialorder %v1340_v20, 8.507059e+37  ;;  %v3271_v49 = vld [vmem:[#allocation9 + $0x148] sm:$0xff] }
 0x3b0   :  { %v2223_v63 = vpop.eup %2222  ;;  %vm1292_vm0 = vmor %vm1290_vm14, %vm1291_vm13  ;;  %1672 = vmatpush.msra.mxu1 %v3271_v49 }
 0x3b1   :  { %v2225_v2 = vpop.eup %2224  ;;  %v1287_v3 = vsub.f32 1.0, %v1286_v60  ;;  %v1308_v4 = vmul.f32 %v2223_v63, %v1306_v55  ;;  %vm1313_vm15 = vweird.f32 %v2223_v63  ;;  %v3279_v55 = vld [vmem:[#allocation9 + $0x120] sm:$0xff]  ;;  %v3285_v60 = vld [vmem:[#allocation9 + $0x130] sm:$0xff] }
 0x3b2   :  { %v1332_v9 = vmul.f32 %v2225_v2, %v1330_v56  ;;  %vm1314_vm6 = vmor %vm1312_vm5, %vm1313_vm15  ;;  %v2227_v22 = vpop.eup %2226  ;;  %vm1337_vm8 = vweird.f32 %v2225_v2  ;;  %v3281_v56 = vld [vmem:[#allocation9 + $0x128] sm:$0xff]  ;;  %1693 = vmatpush.msrb.mxu2 %v3285_v60 }
 0x3b3   :  { %v1309_v10 = vsub.f32 1.0, %v1308_v4  ;;  %v1288_v12 = vmul.f32 %v2221_v59, %v1287_v3  ;;  %vm1338_vm10 = vmor %vm1336_vm9, %vm1337_vm8  ;;  %1673 = vmatpush.msra.mxu1 %v3281_v56  ;;  %v3293_v4 = vld [vmem:[#allocation9 + $0x108] sm:$0xff] }
 0x3b4   :  { %v1333_v15 = vsub.f32 1.0, %v1332_v9  ;;  %v3297_v9 = vld [vmem:[#allocation9 + $0x118] sm:$0xff]  ;;  %1694 = vmatpush.msrb.mxu2 %v3295_v11 }
 0x3b5   :  { %v1289_v51 = vadd.f32 %v2221_v59, %v1288_v12  ;;  %v1310_v54 = vmul.f32 %v2223_v63, %v1309_v10  ;;  %1674 = vmatpush.msra.mxu1 %v3293_v4 }
 0x3b6   :  { %v1334_v33 = vmul.f32 %v2225_v2, %v1333_v15 }
 0x3b7   :  { %v1293_v5 = vsel %vm1292_vm0, %v2221_v59, %v1289_v51  ;;  %v1311_v8 = vadd.f32 %v2223_v63, %v1310_v54  ;;  %v3307_v54 = vld [vmem:[#allocation9 + $0xf0] sm:$0xff]  ;;  %1675 = vmatpush.msra.mxu1 %v3303_v45 }
 0x3b8   :  { %v1298_v41 = vsel %vm1295_vm4, %v1297_v62, %v1293_v5  ;;  %v1335_v25 = vadd.f32 %v2225_v2, %v1334_v33  ;;  %v3315_v5 = vld [vmem:[#allocation9 + $0xc0] sm:$0xff]  ;;  %1695 = vmatpush.msrb.mxu2 %v3307_v54 }
 0x3b9   :  { %v1315_v18 = vsel %vm1314_vm6, %v2223_v63, %v1311_v8  ;;  %v1347_v1 = vmul.f32 %v2227_v22, %v1298_v41  ;;  %v3287_v63 = vld [vmem:[#allocation9 + $0x138] sm:$0xff]  ;;  %v3317_v8 = vld [vmem:[#allocation9 + $0xc8] sm:$0xff]  ;;  %v3330_v33 = vld [vmem:[#allocation9 + $0xa0] sm:$0xff] }
 0x3ba   :  { %v1320_v50 = vsel %vm1317_vm7, %v1319_v21, %v1315_v18  ;;  %v1339_v29 = vsel %vm1338_vm10, %v2225_v2, %v1335_v25  ;;  %1713 = vmatpush.msrb.mxu3 %v3287_v63  ;;  %v1353_v41 = vld [vmem:[#allocation2 + $0x5] ss:$8 sm:$0xf]  ;;  %1676 = vmatpush.msra.mxu1 %v3317_v8 }
 0x3bb   :  { %v1346_v27 = vmul.f32 %v1320_v50, %v3199_v31  ;;  %v1344_v6 = vsel %vm1341_vm11, %v1343_v58, %v1339_v29  ;;  %v3209_v31 = vld [vmem:[#allocation9 + $0x1e0] sm:$0xff]  ;;  %v3322_v18 = vld [vmem:[#allocation9 + $0xd0] sm:$0xff]  ;;  %v3324_v22 = vld [vmem:[#allocation9 + $0xd8] sm:$0xff] }
 0x3bc   :  { %1647 = vmatpush.msra.mxu0 %v3209_v31  ;;  %1714 = vmatpush.msrb.mxu3 %v3297_v9  ;;  %v3338_v25 = vld [vmem:[#allocation9 + $0xb8] sm:$0xff]  ;;  %v3345_v58 = vld [vmem:[#allocation9 + $0x80] sm:$0xff] }
 0x3bd   :  { %v3206_v24 = vadd.f32 %v1347_v1, %v1346_v27  ;;  %v3332_v27 = vld [vmem:[#allocation9 + $0xa8] sm:$0xff]  ;;  %v3336_v1 = vld [vmem:[#allocation9 + $0xb0] sm:$0xff]  ;;  %1696 = vmatpush.msrb.mxu2 %v3322_v18 }
 0x3be   :  { %1648 = vmatpush.msra.mxu0 %v3221_v17  ;;  %1715 = vmatpush.msrb.mxu3 %v3309_v57 }
 0x3bf   :  { %2228 = vtanh.f32 %v3206_v24  ;;  %1677 = vmatpush.msra.mxu1 %v3332_v27  ;;  %1697 = vmatpush.msrb.mxu2 %v3336_v1 }
 0x3c0   :  { %1649 = vmatpush.msra.mxu0 %v3233_v26  ;;  %1716 = vmatpush.msrb.mxu3 %v3324_v22 }
 0x3c2   :  { %1650 = vmatpush.msra.mxu0 %v3245_v35  ;;  %1717 = vmatpush.msrb.mxu3 %v3338_v25 }
 0x3c4   :  { %1651 = vmatpush.msra.mxu0 %v3257_v40 }
 0x3c5   :  { %v2229_v36 = vpop.eup %2228 }
 0x3c6   :  { %v1350_v46 = vmul.f32 %v2229_v36, %v1344_v6  ;;  %1652 = vmatpush.msra.mxu0 %v3269_v48  ;;  %v3347_v36 = vld [vmem:[#allocation9 + $0x88] sm:$0xff]  ;;  %v3351_v6 = vld [vmem:[#allocation9 + $0x90] sm:$0xff] }
 0x3c7   :  { %1678 = vmatpush.msra.mxu1 %v3347_v36  ;;  %1698 = vmatpush.msrb.mxu2 %v3351_v6 }
 0x3c8   :  { %1351 = vst [vmem:[#allocation3 + $0x4] sm:$0x1] %v1350_v46  ;;  %1434 = vmatmul.f32.vlgmr.msrb.gmra.mxu0 %v1350_v46  ;;  %1454 = vmatmul.f32.vlgmr.msrb.gmra.mxu1 %v1350_v46 }
 0x3c9   :  { %1474 = vmatmul.f32.vlgmr.msra.gmra.mxu2 %v1350_v46  ;;  %1494 = vmatmul.f32.vlgmr.msra.gmra.mxu3 %v1350_v46  ;;  %v3353_v46 = vld [vmem:[#allocation9 + $0x98] sm:$0xff] }
 0x3ca   :  { %1653 = vmatpush.msra.mxu0 %v3279_v55  ;;  %1718 = vmatpush.msrb.mxu3 %v3353_v46 }
 0x3cc   :  { %1654 = vmatpush.msra.mxu0 %v3289_v0 }
 0x3ce   :  { %1655 = vmatpush.msra.mxu0 %v3301_v13 }
 0x3d0   :  { %1656 = vmatpush.msra.mxu0 %v3315_v5 }
 0x3d2   :  { %1657 = vmatpush.msra.mxu0 %v3330_v33 }
 0x3d4   :  { %1658 = vmatpush.msra.mxu0 %v3345_v58 }
 0x445   :  { %v1455_v44 = vpop.f32.mrf.mxu1  ;;  %v1435_v51 = vpop.f32.mrf.mxu0 }
 0x446   :  { %v1502_v59 = vrot.slane %v1455_v44, 7 }
 0x448   :  { %v1505_v62 = vsel %vm357_vm1, %v1435_v51, %v1502_v59  ;;  %v3369_v51 = vld [vmem:[#allocation9 + $0x40] sm:$0xff] }
 0x449   :  { %3610 = vst [vmem:[#allocation33_spill] sm:$0xff] %v3369_v51 }
 0x44c   :  { %v1475_v2 = vpop.f32.mrf.mxu2  ;;  %v1495_v3 = vpop.f32.mrf.mxu3 }
 0x44d   :  { %v1503_v10 = vrot.slane %v1475_v2, 6  ;;  %v1504_v12 = vrot.slane %v1495_v3, 5  ;;  %v3357_v2 = vld [vmem:[#allocation9 + $0x60] sm:$0xff]  ;;  %v3359_v3 = vld [vmem:[#allocation9 + $0x68] sm:$0xff] }
 0x44e   :  { %3607 = vst [vmem:[#allocation30_spill] sm:$0xff] %v3359_v3  ;;  %1659 = vmatpush.msra.mxu0 %v3357_v2  ;;  %1679 = vmatpush.msra.mxu1 %v3359_v3 }
 0x44f   :  { %v1506_v15 = vsel %vm359_vm2, %v1503_v10, %v1504_v12  ;;  %v3363_v10 = vld [vmem:[#allocation9 + $0x70] sm:$0xff]  ;;  %v3365_v12 = vld [vmem:[#allocation9 + $0x78] sm:$0xff] }
 0x450   :  { %v1507_v21 = vsel %vm361_vm3, %v1505_v62, %v1506_v15  ;;  %3608 = vst [vmem:[#allocation31_spill] sm:$0xff] %v3363_v10  ;;  %v3371_v62 = vld [vmem:[#allocation9 + $0x48] sm:$0xff]  ;;  %v3375_v15 = vld [vmem:[#allocation9 + $0x50] sm:$0xff]  ;;  %1699 = vmatpush.msrb.mxu2 %v3363_v10  ;;  %1719 = vmatpush.msrb.mxu3 %v3365_v12 }
 0x451   :  { %v3326_v50 = vadd.f32 %v1507_v21, %v1353_v41  ;;  %3609 = vst [vmem:[#allocation32_spill] sm:$0xff] %v3365_v12  ;;  %v3377_v41 = vld [vmem:[#allocation9 + $0x58] sm:$0xff]  ;;  %v3381_v21 = vld [vmem:[#allocation9 + $0x20] sm:$0xff]  ;;  %1660 = vmatpush.msra.mxu0 %v3369_v51  ;;  %1680 = vmatpush.msra.mxu1 %v3371_v62  ;;  %v3395_v12 = vld [vmem:[#allocation9 + $0x8] sm:$0xff] }
 0x452   :  { %3611 = vst [vmem:[#allocation34_spill] sm:$0xff] %v3371_v62  ;;  %1700 = vmatpush.msrb.mxu2 %v3375_v15  ;;  %1720 = vmatpush.msrb.mxu3 %v3377_v41  ;;  %v3401_v62 = vld [vmem:[#allocation9 + $0x10] sm:$0xff]  ;;  %v3403_v51 = vld [vmem:[#allocation9 + $0x18] sm:$0xff] }
 0x453   :  { %v2129_v30 = vmul.f32 -1.442695, %v3326_v50  ;;  %v1530_v20 = vrot.slane %v3326_v50, 1  ;;  %v1554_v29 = vrot.slane %v3326_v50, 3  ;;  %3612 = vst [vmem:[#allocation35_spill] sm:$0xff] %v3375_v15  ;;  %1661 = vmatpush.msra.mxu0 %v3381_v21 }
 0x454   :  { %3613 = vst [vmem:[#allocation36_spill] sm:$0xff] %v3377_v41 }
 0x455   :  { %2230 = vpow2.f32 %v2129_v30  ;;  %v2130_v44 = vmul.f32 -1.442695, %v1530_v20  ;;  %v2131_v59 = vmul.f32 -1.442695, %v1554_v29  ;;  %v3383_v30 = vld [vmem:[#allocation9 + $0x28] sm:$0xff]  ;;  %v3387_v20 = vld [vmem:[#allocation9 + $0x30] sm:$0xff] }
 0x456   :  { %v3389_v29 = vld [vmem:[#allocation9 + $0x38] sm:$0xff]  ;;  %1681 = vmatpush.msra.mxu1 %v3383_v30  ;;  %1701 = vmatpush.msrb.mxu2 %v3387_v20 }
 0x457   :  { %2232 = vpow2.f32 %v2130_v44  ;;  %1721 = vmatpush.msrb.mxu3 %v3389_v29 }
 0x458   :  { %2234 = vpow2.f32 %v2131_v59  ;;  %v3393_v59 = vld [vmem:[#allocation9] sm:$0xff]  ;;  %1682 = vmatpush.msra.mxu1 %v3395_v12  ;;  %1702 = vmatpush.msrb.mxu2 %v3401_v62 }
 0x459   :  { %1662 = vmatpush.msra.mxu0 %v3393_v59  ;;  %1722 = vmatpush.msrb.mxu3 %v3403_v51 }
 0x45a   :  { %1896 = vmatpush.msrb.mxu1 %v3211_v7  ;;  %1916 = vmatpush.msra.mxu2 %v3213_v14  ;;  %v1551_v14 = vrot.slane %v3326_v50, 2 }
 0x45b   :  { %v2231_v44 = vpop.eup %2230  ;;  %1876 = vmatpush.msrb.mxu0 %v3209_v31  ;;  %1936 = vmatpush.msra.mxu3 %v3217_v16  ;;  %v3620_v50 = vld [vmem:[#allocation36_spill] sm:$0xff] }
 0x45c   :  { %v3397_v10 = vadd.f32 1.0, %v2231_v44  ;;  %1897 = vmatpush.msrb.mxu1 %v3223_v19  ;;  %1917 = vmatpush.msra.mxu2 %v3225_v61 }
 0x45d   :  { %v2233_v3 = vpop.eup %2232  ;;  %1877 = vmatpush.msrb.mxu0 %v3221_v17  ;;  %1937 = vmatpush.msra.mxu3 %v3229_v23 }
 0x45e   :  { %v2235_v41 = vpop.eup %2234  ;;  %2236 = vrcp.f32 %v3397_v10  ;;  %v3408_v15 = vadd.f32 1.0, %v2233_v3  ;;  %1898 = vmatpush.msrb.mxu1 %v3235_v28  ;;  %1918 = vmatpush.msra.mxu2 %v3237_v32  ;;  %v1525_v61 = vand.u32 2147483648, %v3397_v10  ;;  %v1523_v32 = vand.u32 2147483647, %v3397_v10 }
 0x45f   :  { %v3412_v44 = vadd.f32 1.0, %v2235_v41  ;;  %1878 = vmatpush.msrb.mxu0 %v3233_v26  ;;  %1938 = vmatpush.msra.mxu3 %v3241_v34  ;;  %vm1519_vm13 = vweird.f32 %v3397_v10 }
 0x460   :  { %2238 = vrcp.f32 %v3408_v15  ;;  %1899 = vmatpush.msrb.mxu1 %v3247_v37  ;;  %1919 = vmatpush.msra.mxu2 %v3249_v38  ;;  %v1547_v34 = vand.u32 2147483648, %v3408_v15  ;;  %v1545_v38 = vand.u32 2147483647, %v3408_v15  ;;  %vm1524_vm0 = vcmp.eq.f32.partialorder %v1523_v32, 8.507059e+37 }
 0x461   :  { %2240 = vrcp.f32 %v3412_v44  ;;  %1879 = vmatpush.msrb.mxu0 %v3245_v35  ;;  %1939 = vmatpush.msra.mxu3 %v3253_v39  ;;  %v1526_v39 = vor.u32 1.1754944e-38, %v1525_v61  ;;  %vm1541_vm4 = vweird.f32 %v3408_v15  ;;  %vm1565_vm8 = vweird.f32 %v3412_v44 }
 0x462   :  { %1900 = vmatpush.msrb.mxu1 %v3259_v42  ;;  %1920 = vmatpush.msra.mxu2 %v3261_v43  ;;  %2242 = vtanh.f32 %v1551_v14  ;;  %vm1546_vm6 = vcmp.eq.f32.partialorder %v1545_v38, 8.507059e+37 }
 0x463   :  { %1880 = vmatpush.msrb.mxu0 %v3257_v40  ;;  %1940 = vmatpush.msra.mxu3 %v3265_v47 }
 0x464   :  { %v2237_v3 = vpop.eup %2236  ;;  %1901 = vmatpush.msrb.mxu1 %v3271_v49  ;;  %1921 = vmatpush.msra.mxu2 %v3273_v52 }
 0x465   :  { %v1515_v31 = vmul.f32 %v2237_v3, %v3397_v10  ;;  %vm1520_vm12 = vweird.f32 %v2237_v3  ;;  %1881 = vmatpush.msrb.mxu0 %v3269_v48  ;;  %1941 = vmatpush.msra.mxu3 %v3277_v53  ;;  %v1548_v48 = vor.u32 1.1754944e-38, %v1547_v34 }
 0x466   :  { %v2239_v7 = vpop.eup %2238  ;;  %vm1521_vm15 = vmor %vm1519_vm13, %vm1520_vm12  ;;  %1902 = vmatpush.msrb.mxu1 %v3281_v56  ;;  %1922 = vmatpush.msra.mxu2 %v3285_v60 }
 0x467   :  { %v3434_v16 = vpop.eup %2240  ;;  %v1516_v17 = vsub.f32 1.0, %v1515_v31  ;;  %v1537_v19 = vmul.f32 %v2239_v7, %v3408_v15  ;;  %vm1542_vm14 = vweird.f32 %v2239_v7  ;;  %1882 = vmatpush.msrb.mxu0 %v3279_v55  ;;  %1942 = vmatpush.msra.mxu3 %v3287_v63  ;;  %v1582_v15 = vld [vmem:[#allocation2 + $0x6] ss:$8 sm:$0xf] }
 0x468   :  { %v1561_v23 = vmul.f32 %v3434_v16, %v3412_v44  ;;  %vm1543_vm5 = vmor %vm1541_vm4, %vm1542_vm14  ;;  %1903 = vmatpush.msrb.mxu1 %v3293_v4  ;;  %1923 = vmatpush.msra.mxu2 %v3295_v11  ;;  %v2243_v52 = vpop.eup %2242  ;;  %vm1566_vm7 = vweird.f32 %v3434_v16  ;;  %v1569_v4 = vand.u32 2147483647, %v3412_v44 }
 0x469   :  { %v1538_v26 = vsub.f32 1.0, %v1537_v19  ;;  %v1517_v28 = vmul.f32 %v2237_v3, %v1516_v17  ;;  %1883 = vmatpush.msrb.mxu0 %v3289_v0  ;;  %1943 = vmatpush.msra.mxu3 %v3297_v9  ;;  %vm1567_vm9 = vmor %vm1565_vm8, %vm1566_vm7  ;;  %v3614_v9 = vld [vmem:[#allocation30_spill] sm:$0xff] }
 0x46a   :  { %v1562_v40 = vsub.f32 1.0, %v1561_v23  ;;  %1904 = vmatpush.msrb.mxu1 %v3303_v45  ;;  %1924 = vmatpush.msra.mxu2 %v3307_v54  ;;  %v3615_v45 = vld [vmem:[#allocation31_spill] sm:$0xff]  ;;  %v3616_v54 = vld [vmem:[#allocation32_spill] sm:$0xff]  ;;  %vm1570_vm10 = vcmp.eq.f32.partialorder %v1569_v4, 8.507059e+37 }
 0x46b   :  { %v1518_v35 = vadd.f32 %v2237_v3, %v1517_v28  ;;  %v1539_v37 = vmul.f32 %v2239_v7, %v1538_v26  ;;  %1884 = vmatpush.msrb.mxu0 %v3301_v13  ;;  %1944 = vmatpush.msra.mxu3 %v3309_v57  ;;  %v3617_v57 = vld [vmem:[#allocation33_spill] sm:$0xff] }
 0x46c   :  { %v1563_v55 = vmul.f32 %v3434_v16, %v1562_v40  ;;  %1905 = vmatpush.msrb.mxu1 %v3317_v8  ;;  %1925 = vmatpush.msra.mxu2 %v3322_v18 }
 0x46d   :  { %v1522_v42 = vsel %vm1521_vm15, %v2237_v3, %v1518_v35  ;;  %v1540_v43 = vadd.f32 %v2239_v7, %v1539_v37  ;;  %1885 = vmatpush.msrb.mxu0 %v3315_v5  ;;  %1945 = vmatpush.msra.mxu3 %v3324_v22  ;;  %v3618_v5 = vld [vmem:[#allocation34_spill] sm:$0xff]  ;;  %v3619_v22 = vld [vmem:[#allocation35_spill] sm:$0xff] }
 0x46e   :  { %v1527_v47 = vsel %vm1524_vm0, %v1526_v39, %v1522_v42  ;;  %v1564_v0 = vadd.f32 %v3434_v16, %v1563_v55  ;;  %1906 = vmatpush.msrb.mxu1 %v3332_v27  ;;  %1926 = vmatpush.msra.mxu2 %v3336_v1 }
 0x46f   :  { %v1544_v49 = vsel %vm1543_vm5, %v2239_v7, %v1540_v43  ;;  %v1576_v60 = vmul.f32 %v2243_v52, %v1527_v47  ;;  %1886 = vmatpush.msrb.mxu0 %v3330_v33  ;;  %1946 = vmatpush.msra.mxu3 %v3338_v25 }
 0x470   :  { %v1549_v53 = vsel %vm1546_vm6, %v1548_v48, %v1544_v49  ;;  %1907 = vmatpush.msrb.mxu1 %v3347_v36  ;;  %1927 = vmatpush.msra.mxu2 %v3351_v6  ;;  %v1568_v11 = vsel %vm1567_vm9, %v3434_v16, %v1564_v0 }
 0x471   :  { %v1575_v56 = vmul.f32 %v1549_v53, %v3206_v24  ;;  %v1571_v24 = vand.u32 2147483648, %v3412_v44  ;;  %1887 = vmatpush.msrb.mxu0 %v3345_v58  ;;  %1947 = vmatpush.msra.mxu3 %v3353_v46 }
 0x472   :  { %1908 = vmatpush.msrb.mxu1 %v3614_v9  ;;  %1928 = vmatpush.msra.mxu2 %v3615_v45 }
 0x473   :  { %v3473_v63 = vadd.f32 %v1576_v60, %v1575_v56  ;;  %1888 = vmatpush.msrb.mxu0 %v3357_v2  ;;  %v1572_v13 = vor.u32 1.1754944e-38, %v1571_v24  ;;  %1948 = vmatpush.msra.mxu3 %v3616_v54 }
 0x474   :  { %1909 = vmatpush.msrb.mxu1 %v3618_v5  ;;  %1929 = vmatpush.msra.mxu2 %v3619_v22  ;;  %v2055_v22 = vld [vmem:[#allocation12 + $0x78] sm:$0xff] }
 0x475   :  { %2244 = vtanh.f32 %v3473_v63  ;;  %1889 = vmatpush.msrb.mxu0 %v3617_v57  ;;  %v1573_v18 = vsel %vm1570_vm10, %v1572_v13, %v1568_v11  ;;  %1949 = vmatpush.msra.mxu3 %v3620_v50  ;;  %v2054_v50 = vld [vmem:[#allocation12 + $0x70] sm:$0xff] }
 0x476   :  { %1910 = vmatpush.msrb.mxu1 %v3383_v30  ;;  %1930 = vmatpush.msra.mxu2 %v3387_v20 }
 0x477   :  { %1890 = vmatpush.msrb.mxu0 %v3381_v21  ;;  %1950 = vmatpush.msra.mxu3 %v3389_v29 }
 0x478   :  { %1911 = vmatpush.msrb.mxu1 %v3395_v12  ;;  %1931 = vmatpush.msra.mxu2 %v3401_v62 }
 0x479   :  { %1891 = vmatpush.msrb.mxu0 %v3393_v59  ;;  %1951 = vmatpush.msra.mxu3 %v3403_v51 }
 0x47b   :  { %v2245_v8 = vpop.eup %2244 }
 0x47c   :  { %v1579_v33 = vmul.f32 %v2245_v8, %v1573_v18 }
 0x47e   :  { %1580 = vst [vmem:[#allocation3 + $0x5] sm:$0x1] %v1579_v33  ;;  %1663 = vmatmul.f32.vlgmr.msra.gmra.mxu0 %v1579_v33  ;;  %1683 = vmatmul.f32.vlgmr.msra.gmra.mxu1 %v1579_v33 }
 0x47f   :  { %1703 = vmatmul.f32.vlgmr.msrb.gmra.mxu2 %v1579_v33  ;;  %1723 = vmatmul.f32.vlgmr.msrb.gmra.mxu3 %v1579_v33 }
 0x480   :  { %2060 = vmatpush.msra.mxu0 %v2055_v22 }
 0x482   :  { %2061 = vmatpush.msra.mxu0 %v2054_v50 }
 0x4fb   :  { %v1684_v27 = vpop.f32.mrf.mxu1  ;;  %v1664_v46 = vpop.f32.mrf.mxu0 }
 0x4fc   :  { %v1731_v1 = vrot.slane %v1684_v27, 7 }
 0x4fe   :  { %v1734_v2 = vsel %vm357_vm1, %v1664_v46, %v1731_v1  ;;  %v2052_v46 = vld [vmem:[#allocation12 + $0x60] sm:$0xff] }
 0x502   :  { %v1704_v25 = vpop.f32.mrf.mxu2  ;;  %v1724_v58 = vpop.f32.mrf.mxu3 }
 0x503   :  { %v1732_v36 = vrot.slane %v1704_v25, 6  ;;  %v1733_v6 = vrot.slane %v1724_v58, 5  ;;  %v2053_v25 = vld [vmem:[#allocation12 + $0x68] sm:$0xff] }
 0x504   :  { %2062 = vmatpush.msra.mxu0 %v2053_v25 }
 0x505   :  { %v1735_v10 = vsel %vm359_vm2, %v1732_v36, %v1733_v6 }
 0x506   :  { %v1736_v41 = vsel %vm361_vm3, %v1734_v2, %v1735_v10  ;;  %2063 = vmatpush.msra.mxu0 %v2052_v46 }
 0x507   :  { %v1738_v21 = vadd.f32 %v1736_v41, %v1582_v15  ;;  %v1811_v15 = vld [vmem:[#allocation2 + $0x7] ss:$8 sm:$0xf] }
 0x509   :  { %v2132_v12 = vmul.f32 -1.442695, %v1738_v21  ;;  %v1759_v30 = vrot.slane %v1738_v21, 1  ;;  %v1783_v62 = vrot.slane %v1738_v21, 3  ;;  %v1780_v19 = vrot.slane %v1738_v21, 2  ;;  %v2051_v21 = vld [vmem:[#allocation12 + $0x58] sm:$0xff] }
 0x50a   :  { %2064 = vmatpush.msra.mxu0 %v2051_v21 }
 0x50b   :  { %2246 = vpow2.f32 %v2132_v12  ;;  %v2133_v51 = vmul.f32 -1.442695, %v1759_v30  ;;  %v2134_v20 = vmul.f32 -1.442695, %v1783_v62  ;;  %v2050_v30 = vld [vmem:[#allocation12 + $0x50] sm:$0xff] }
 0x50c   :  { %2065 = vmatpush.msra.mxu0 %v2050_v30 }
 0x50d   :  { %2248 = vpow2.f32 %v2133_v51 }
 0x50e   :  { %2250 = vpow2.f32 %v2134_v20 }
 0x511   :  { %v2247_v29 = vpop.eup %2246 }
 0x512   :  { %v1742_v59 = vadd.f32 1.0, %v2247_v29  ;;  %v2049_v29 = vld [vmem:[#allocation12 + $0x48] sm:$0xff] }
 0x513   :  { %v2249_v44 = vpop.eup %2248  ;;  %2066 = vmatpush.msra.mxu0 %v2049_v29 }
 0x514   :  { %v2251_v3 = vpop.eup %2250  ;;  %2252 = vrcp.f32 %v1742_v59  ;;  %v1764_v31 = vadd.f32 1.0, %v2249_v44  ;;  %v1754_v28 = vand.u32 2147483648, %v1742_v59  ;;  %v1752_v37 = vand.u32 2147483647, %v1742_v59 }
 0x515   :  { %v1788_v7 = vadd.f32 1.0, %v2251_v3  ;;  %vm1748_vm12 = vweird.f32 %v1742_v59  ;;  %v2048_v3 = vld [vmem:[#allocation12 + $0x40] sm:$0xff] }
 0x516   :  { %2254 = vrcp.f32 %v1764_v31  ;;  %v1776_v38 = vand.u32 2147483648, %v1764_v31  ;;  %v1774_v42 = vand.u32 2147483647, %v1764_v31  ;;  %v1755_v43 = vor.u32 1.1754944e-38, %v1754_v28  ;;  %2067 = vmatpush.msra.mxu0 %v2048_v3 }
 0x517   :  { %2256 = vrcp.f32 %v1788_v7  ;;  %vm1753_vm15 = vcmp.eq.f32.partialorder %v1752_v37, 8.507059e+37  ;;  %vm1770_vm0 = vweird.f32 %v1764_v31  ;;  %v1800_v13 = vand.u32 2147483648, %v1788_v7 }
 0x518   :  { %2258 = vtanh.f32 %v1780_v19  ;;  %v1777_v53 = vor.u32 1.1754944e-38, %v1776_v38  ;;  %vm1775_vm5 = vcmp.eq.f32.partialorder %v1774_v42, 8.507059e+37  ;;  %vm1794_vm7 = vweird.f32 %v1788_v7  ;;  %v2040_v38 = vld [vmem:[#allocation12] sm:$0xff] }
 0x519   :  { %v1798_v45 = vand.u32 2147483647, %v1788_v7  ;;  %v1801_v57 = vor.u32 1.1754944e-38, %v1800_v13 }
 0x51a   :  { %v2253_v14 = vpop.eup %2252 }
 0x51b   :  { %v1744_v16 = vmul.f32 %v2253_v14, %v1742_v59  ;;  %vm1749_vm11 = vweird.f32 %v2253_v14  ;;  %vm1799_vm9 = vcmp.eq.f32.partialorder %v1798_v45, 8.507059e+37 }
 0x51c   :  { %v2255_v17 = vpop.eup %2254  ;;  %vm1750_vm14 = vmor %vm1748_vm12, %vm1749_vm11 }
 0x51d   :  { %v2257_v61 = vpop.eup %2256  ;;  %v1745_v23 = vsub.f32 1.0, %v1744_v16  ;;  %v1766_v26 = vmul.f32 %v2255_v17, %v1764_v31  ;;  %vm1771_vm13 = vweird.f32 %v2255_v17  ;;  %v2047_v31 = vld [vmem:[#allocation12 + $0x38] sm:$0xff] }
 0x51e   :  { %v1790_v32 = vmul.f32 %v2257_v61, %v1788_v7  ;;  %vm1772_vm4 = vmor %vm1770_vm0, %vm1771_vm13  ;;  %v2259_v56 = vpop.eup %2258  ;;  %vm1795_vm6 = vweird.f32 %v2257_v61  ;;  %2068 = vmatpush.msra.mxu0 %v2047_v31  ;;  %v2046_v7 = vld [vmem:[#allocation12 + $0x30] sm:$0xff] }
 0x51f   :  { %v1767_v34 = vsub.f32 1.0, %v1766_v26  ;;  %v1746_v35 = vmul.f32 %v2253_v14, %v1745_v23  ;;  %vm1796_vm8 = vmor %vm1794_vm7, %vm1795_vm6  ;;  %v2044_v23 = vld [vmem:[#allocation12 + $0x20] sm:$0xff] }
 0x520   :  { %v1791_v47 = vsub.f32 1.0, %v1790_v32  ;;  %2069 = vmatpush.msra.mxu0 %v2046_v7  ;;  %v2043_v32 = vld [vmem:[#allocation12 + $0x18] sm:$0xff] }
 0x521   :  { %v1747_v39 = vadd.f32 %v2253_v14, %v1746_v35  ;;  %v1768_v40 = vmul.f32 %v2255_v17, %v1767_v34  ;;  %v2042_v34 = vld [vmem:[#allocation12 + $0x10] sm:$0xff]  ;;  %v2041_v35 = vld [vmem:[#allocation12 + $0x8] sm:$0xff] }
 0x522   :  { %v1792_v0 = vmul.f32 %v2257_v61, %v1791_v47 }
 0x523   :  { %v1751_v48 = vsel %vm1750_vm14, %v2253_v14, %v1747_v39  ;;  %v1769_v49 = vadd.f32 %v2255_v17, %v1768_v40 }
 0x524   :  { %v1756_v52 = vsel %vm1753_vm15, %v1755_v43, %v1751_v48  ;;  %v1793_v9 = vadd.f32 %v2257_v61, %v1792_v0 }
 0x525   :  { %v1773_v55 = vsel %vm1772_vm4, %v2255_v17, %v1769_v49  ;;  %v1805_v4 = vmul.f32 %v2259_v56, %v1756_v52  ;;  %v2045_v17 = vld [vmem:[#allocation12 + $0x28] sm:$0xff] }
 0x526   :  { %v1778_v60 = vsel %vm1775_vm5, %v1777_v53, %v1773_v55  ;;  %v1797_v54 = vsel %vm1796_vm8, %v2257_v61, %v1793_v9  ;;  %2070 = vmatpush.msra.mxu0 %v2045_v17 }
 0x527   :  { %v1804_v24 = vmul.f32 %v1778_v60, %v3473_v63  ;;  %v1802_v8 = vsel %vm1799_vm9, %v1801_v57, %v1797_v54 }
 0x528   :  { %2071 = vmatpush.msra.mxu0 %v2044_v23 }
 0x529   :  { %v3512_v11 = vadd.f32 %v1805_v4, %v1804_v24 }
 0x52a   :  { %2072 = vmatpush.msra.mxu0 %v2043_v32 }
 0x52b   :  { %2260 = vtanh.f32 %v3512_v11 }
 0x52c   :  { %2073 = vmatpush.msra.mxu0 %v2042_v34 }
 0x52e   :  { %2074 = vmatpush.msra.mxu0 %v2041_v35 }
 0x530   :  { %2075 = vmatpush.msra.mxu0 %v2040_v38 }
 0x531   :  { %v2261_v5 = vpop.eup %2260 }
 0x532   :  { %v1808_v18 = vmul.f32 %v2261_v5, %v1802_v8 }
 0x534   :  { %1809 = vst [vmem:[#allocation3 + $0x6] sm:$0x1] %v1808_v18  ;;  %1892 = vmatmul.f32.vlgmr.msrb.gmra.mxu0 %v1808_v18  ;;  %1912 = vmatmul.f32.vlgmr.msrb.gmra.mxu1 %v1808_v18 }
 0x535   :  { %1932 = vmatmul.f32.vlgmr.msra.gmra.mxu2 %v1808_v18  ;;  %1952 = vmatmul.f32.vlgmr.msra.gmra.mxu3 %v1808_v18 }
 0x5b1   :  { %v1913_v63 = vpop.f32.mrf.mxu1  ;;  %v1893_v6 = vpop.f32.mrf.mxu0 }
 0x5b2   :  { %v1960_v33 = vrot.slane %v1913_v63, 7 }
 0x5b4   :  { %v1963_v2 = vsel %vm357_vm1, %v1893_v6, %v1960_v33 }
 0x5b8   :  { %v1933_v27 = vpop.f32.mrf.mxu2  ;;  %v1953_v1 = vpop.f32.mrf.mxu3 }
 0x5b9   :  { %v1961_v58 = vrot.slane %v1933_v27, 6  ;;  %v1962_v36 = vrot.slane %v1953_v1, 5 }
 0x5bb   :  { %v1964_v10 = vsel %vm359_vm2, %v1961_v58, %v1962_v36 }
 0x5bc   :  { %v1965_v41 = vsel %vm361_vm3, %v1963_v2, %v1964_v10 }
 0x5bd   :  { %v1967_v12 = vadd.f32 %v1965_v41, %v1811_v15 }
 0x5bf   :  { %v2135_v62 = vmul.f32 -1.442695, %v1967_v12  ;;  %v1988_v51 = vrot.slane %v1967_v12, 1  ;;  %v2012_v20 = vrot.slane %v1967_v12, 3  ;;  %v2009_v43 = vrot.slane %v1967_v12, 2 }
 0x5c1   :  { %2262 = vpow2.f32 %v2135_v62  ;;  %v2136_v59 = vmul.f32 -1.442695, %v1988_v51  ;;  %v2137_v44 = vmul.f32 -1.442695, %v2012_v20 }
 0x5c3   :  { %2264 = vpow2.f32 %v2136_v59 }
 0x5c4   :  { %2266 = vpow2.f32 %v2137_v44 }
 0x5c7   :  { %v2263_v14 = vpop.eup %2262 }
 0x5c8   :  { %v1971_v16 = vadd.f32 1.0, %v2263_v14 }
 0x5c9   :  { %v2265_v19 = vpop.eup %2264 }
 0x5ca   :  { %v2267_v61 = vpop.eup %2266  ;;  %2268 = vrcp.f32 %v1971_v16  ;;  %v1993_v26 = vadd.f32 1.0, %v2265_v19  ;;  %v1983_v52 = vand.u32 2147483648, %v1971_v16  ;;  %v1981_v55 = vand.u32 2147483647, %v1971_v16 }
 0x5cb   :  { %v2017_v28 = vadd.f32 1.0, %v2267_v61  ;;  %vm1977_vm2 = vweird.f32 %v1971_v16 }
 0x5cc   :  { %2270 = vrcp.f32 %v1993_v26  ;;  %v2005_v0 = vand.u32 2147483648, %v1993_v26  ;;  %v2003_v4 = vand.u32 2147483647, %v1993_v26  ;;  %v1984_v13 = vor.u32 1.1754944e-38, %v1983_v52 }
 0x5cd   :  { %2272 = vrcp.f32 %v2017_v28  ;;  %vm1982_vm11 = vcmp.eq.f32.partialorder %v1981_v55, 8.507059e+37  ;;  %vm1999_vm12 = vweird.f32 %v1993_v26  ;;  %v2029_v25 = vand.u32 2147483648, %v2017_v28 }
 0x5ce   :  { %2274 = vtanh.f32 %v2009_v43  ;;  %v2006_v5 = vor.u32 1.1754944e-38, %v2005_v0  ;;  %vm2004_vm14 = vcmp.eq.f32.partialorder %v2003_v4, 8.507059e+37  ;;  %vm2023_vm0 = vweird.f32 %v2017_v28 }
 0x5cf   :  { %v2027_v58 = vand.u32 2147483647, %v2017_v28  ;;  %v2030_v6 = vor.u32 1.1754944e-38, %v2029_v25 }
 0x5d0   :  { %v2269_v37 = vpop.eup %2268 }
 0x5d1   :  { %v1973_v39 = vmul.f32 %v2269_v37, %v1971_v16  ;;  %vm1978_vm1 = vweird.f32 %v2269_v37  ;;  %vm2028_vm5 = vcmp.eq.f32.partialorder %v2027_v58, 8.507059e+37 }
 0x5d2   :  { %v2271_v40 = vpop.eup %2270  ;;  %vm1979_vm3 = vmor %vm1977_vm2, %vm1978_vm1 }
 0x5d3   :  { %v1974_v42 = vsub.f32 1.0, %v1973_v39  ;;  %v2273_v47 = vpop.eup %2272  ;;  %v1995_v48 = vmul.f32 %v2271_v40, %v1993_v26  ;;  %vm2000_vm10 = vweird.f32 %v2271_v40 }
 0x5d4   :  { %v2019_v53 = vmul.f32 %v2273_v47, %v2017_v28  ;;  %vm2001_vm13 = vmor %vm1999_vm12, %vm2000_vm10  ;;  %v2275_v18 = vpop.eup %2274  ;;  %vm2024_vm15 = vweird.f32 %v2273_v47 }
 0x5d5   :  { %v1975_v49 = vmul.f32 %v2269_v37, %v1974_v42  ;;  %v1996_v56 = vsub.f32 1.0, %v1995_v48  ;;  %vm2025_vm4 = vmor %vm2023_vm0, %vm2024_vm15 }
 0x5d6   :  { %v2020_v45 = vsub.f32 1.0, %v2019_v53 }
 0x5d7   :  { %v1976_v60 = vadd.f32 %v2269_v37, %v1975_v49  ;;  %v1997_v24 = vmul.f32 %v2271_v40, %v1996_v56 }
 0x5d8   :  { %v2021_v22 = vmul.f32 %v2273_v47, %v2020_v45 }
 0x5d9   :  { %v1980_v9 = vsel %vm1979_vm3, %v2269_v37, %v1976_v60  ;;  %v1998_v54 = vadd.f32 %v2271_v40, %v1997_v24 }
 0x5da   :  { %v1985_v57 = vsel %vm1982_vm11, %v1984_v13, %v1980_v9  ;;  %v2022_v1 = vadd.f32 %v2273_v47, %v2021_v22 }
 0x5db   :  { %v2002_v8 = vsel %vm2001_vm13, %v2271_v40, %v1998_v54  ;;  %v2034_v33 = vmul.f32 %v2275_v18, %v1985_v57 }
 0x5dc   :  { %v2007_v63 = vsel %vm2004_vm14, %v2006_v5, %v2002_v8  ;;  %v2026_v36 = vsel %vm2025_vm4, %v2273_v47, %v2022_v1 }
 0x5dd   :  { %v2033_v50 = vmul.f32 %v2007_v63, %v3512_v11  ;;  %v2031_v2 = vsel %vm2028_vm5, %v2030_v6, %v2026_v36  ;;  %v2149_v11 = vld [vmem:[%s3530_s5] ss:$0 sm:$0xff] }
 0x5df   :  { %v2035_v27 = vadd.f32 %v2034_v33, %v2033_v50 }
 0x5e1   :  { %2276 = vtanh.f32 %v2035_v27 }
 0x5e7   :  { %v2277_v46 = vpop.eup %2276 }
 0x5e8   :  { %v2037_v10 = vmul.f32 %v2277_v46, %v2031_v2 }
 0x5ea   :  { %2038 = vst [vmem:[#allocation3 + $0x7] sm:$0x1] %v2037_v10 }
 0x5f1   :  { %v2039_v15 = vld [vmem:[#allocation3] sm:$0xff] }
 0x5f2   :  { %2076 = vmatmul.f32.vlgmr.msra.gmra.mxu0 %v2039_v15 }
 0x66f   :  { %v2077_v41 = vpop.f32.mrf.mxu0 }
 0x670   :  { %v2078_v21 = vadd.f32 %v2149_v11, %v2077_v41 }
 0x672   :  { %2080 = vmax.xlane.f32.xlu0 %v2078_v21 }
 0x6e5   :  { %v2081_v12 = vpop.xlane.xlu0 %2080 }
 0x6e6   :  { %v2082_v30 = vsub.f32 %v2078_v21, %v2081_v12 }
 0x6e8   :  { %v2083_v62 = vmul.f32 1.442695, %v2082_v30 }
 0x6ea   :  { %2278 = vpow2.f32 %v2083_v62 }
 0x6f0   :  { %v2279_v51 = vpop.eup %2278 }
 0x6f1   :  { %2085 = vadd.xlane.f32.xlu0 %v2279_v51 }
 0x764   :  { %v2086_v20 = vpop.xlane.xlu0 %2085 }
 0x765   :  { %2280 = vlog2.f32 %v2086_v20 }
 0x76b   :  { %v2281_v29 = vpop.eup %2280 }
 0x76c   :  { %v2088_v59 = vmul.f32 0.6931472, %v2281_v29 }
 0x76e   :  { %v2089_v44 = vsub.f32 %v2082_v30, %v2088_v59 }
 0x770   :  { %2090 = vst [vmem:[#allocation13] sm:$0xff] %v2089_v44 }
 0x771   :  { %2101 = dma.vmem_to_hbm [thread:$0]  %s2097_s24, 128, %s2099_s27, [#allocation6]  }
 0x772   :  { %2432 = dma.done.wait [#allocation6], 128  }
 0x773   :  { %2433 = vsyncadd [#allocation6], 4294967168 }
 0x774   :  { %2106 = vsyncpa [#allocation5], 1 }
 0x775   :  { %2107 = vsyncpa [#allocation8], 1 }
 0x776   :  { %2108 = vsyncpa [#allocation11], 1 }
 0x777   :  { %2109 = vsyncpa [#allocation6], 1 }

</bundles_post_ra>
